<compile_context>
chip_gen: v5e
topology: v5e:2x2
jax: 0.10.0
libtpu: 0.0.40
codegen_flags: <defaults>
</compile_context>

<pallas_src>
import jax
import jax.numpy as jnp
from jax.experimental import pallas as pl
from jax.experimental.pallas import tpu as pltpu

_LANE = 128
_K_ALIGN = 16            # bf16 packs 2 rows per sublane -> keep K 16-aligned
_M_TILE_CONV = 2048      # lanes per grid step for the conv patch RHS
_M_TILE_FC = 1024        # lanes per grid step for the FC head (K=2048 is big)


def _ceil_to(x, m):
    return ((x + m - 1) // m) * m


def _num_tensorcores():
    """2-way grid split only pays off on v7x (2 TensorCores per chip)."""
    try:
        kind = jax.devices()[0].device_kind.lower()
    except Exception:
        return 1
    return 2 if ("v7" in kind or "7x" in kind) else 1


def _m_tiling(m_total, num_split, max_tile):
    """Pick a 128-aligned lane tile: bounded by max_tile, split >= num_split ways."""
    per_split = -(-m_total // max(num_split, 1))
    tile = min(max_tile, _ceil_to(per_split, _LANE))
    m_pad = _ceil_to(m_total, tile)
    return tile, m_pad, m_pad // tile


def _cparams(n_grid_axes, block_nbytes):
    # Explicit VMEM budget: double-buffered blocks + headroom, clamped so it is
    # valid on every generation (v5e 128 MiB phys, v7x 64 MiB phys per TC).
    est = 3 * sum(block_nbytes) + (4 << 20)
    vmem = int(min(max(est, 16 << 20), 32 << 20))
    return pltpu.CompilerParams(
        dimension_semantics=("parallel",) * n_grid_axes,
        vmem_limit_bytes=vmem)


# ---------------------------------------------------------------------------
# Pallas kernels
# ---------------------------------------------------------------------------
def _conv_kernel(w_ref, p_ref, b_ref, o_ref):
    # (Cout, Kp) @ (Kp, tm) on the MXU; f32 accumulate, bias + ReLU, bf16 store.
    acc = jnp.dot(w_ref[...], p_ref[...], preferred_element_type=jnp.float32)
    o_ref[...] = jnp.maximum(acc + b_ref[...], 0.0).astype(o_ref.dtype)


def _conv_pool_kernel(w_ref, p_ref, b_ref, o_ref):
    # conv + bias + ReLU + fused 2x2/stride-2 max-pool.  p_ref is (4, Kp, tm):
    # one patch slab per pool quadrant, identical lane ordering, so the pool is
    # a max over four matmul results (max commutes with +bias and ReLU).
    w = w_ref[...]
    q0 = jnp.dot(w, p_ref[0], preferred_element_type=jnp.float32)
    q1 = jnp.dot(w, p_ref[1], preferred_element_type=jnp.float32)
    q2 = jnp.dot(w, p_ref[2], preferred_element_type=jnp.float32)
    q3 = jnp.dot(w, p_ref[3], preferred_element_type=jnp.float32)
    m = jnp.maximum(jnp.maximum(q0, q1), jnp.maximum(q2, q3))
    o_ref[...] = jnp.maximum(m + b_ref[...], 0.0).astype(o_ref.dtype)


def _fc_kernel(x_ref, w1_ref, b1_ref, w2_ref, b2_ref, o_ref):
    # Channels-first fused fc1 + ReLU + fc2 (dropout = identity in eval mode):
    # h = relu(W1 @ x + b1); o = W2 @ h + b2, with x = (2048, tn), lanes = N.
    h = jnp.dot(w1_ref[...], x_ref[...], preferred_element_type=jnp.float32)
    h = jnp.maximum(h + b1_ref[...], 0.0)
    o = jnp.dot(w2_ref[...], h.astype(jnp.bfloat16),
                preferred_element_type=jnp.float32)
    o_ref[...] = o + b2_ref[...]


# ---------------------------------------------------------------------------
# JAX glue: channels-first, batch-last im2col (slices + reshape only)
# ---------------------------------------------------------------------------
def _prep_wb(w, b):
    Cout, Cin, kh, kw = w.shape
    K = Cin * kh * kw
    Kp = _ceil_to(K, _K_ALIGN)
    w2 = w.reshape(Cout, K)
    if Kp != K:
        w2 = jnp.pad(w2, ((0, 0), (0, Kp - K)))
    return w2.astype(jnp.bfloat16), b.reshape(Cout, 1).astype(jnp.float32), K, Kp


def _im2col_nlast(act, kh, kw):
    # act: (C, H, W, N) bf16 -> K-major patches (C*kh*kw, Ho*Wo*N), with
    # k = c*kh*kw + ki*kw + kj (matches w.reshape(Cout, Cin*kh*kw)) and
    # m = (ho*Wo + wo)*N + n.  Pure slices + stack + row-major reshape.
    C, H, W, N = act.shape
    Ho, Wo = H - kh + 1, W - kw + 1
    sl = [act[:, i:i + Ho, j:j + Wo, :] for i in range(kh) for j in range(kw)]
    p = jnp.stack(sl, axis=1)                       # (C, kh*kw, Ho, Wo, N)
    return p.reshape(C * kh * kw, Ho * Wo * N), Ho, Wo


def conv2d_relu(act, w, b, num_tc):
    """3x3 valid conv + ReLU.  act: (Cin, H, W, N) bf16 -> (Cout, H-2, W-2, N) bf16."""
    Cout = w.shape[0]
    N = act.shape[3]
    w2, b2, K, Kp = _prep_wb(w, b)
    patches, Ho, Wo = _im2col_nlast(act, w.shape[2], w.shape[3])
    M = patches.shape[1]
    tm, Mp, steps = _m_tiling(M, num_tc, _M_TILE_CONV)
    p = jnp.pad(patches, ((0, Kp - K), (0, Mp - M)))          # bf16

    blk = (Cout * Kp * 2, Kp * tm * 2, Cout * 4, Cout * tm * 2)
    out = pl.pallas_call(
        _conv_kernel,
        out_shape=jax.ShapeDtypeStruct((Cout, Mp), jnp.bfloat16),
        grid=(steps,),
        in_specs=[pl.BlockSpec((Cout, Kp), lambda m: (0, 0)),
                  pl.BlockSpec((Kp, tm), lambda m: (0, m)),
                  pl.BlockSpec((Cout, 1), lambda m: (0, 0))],
        out_specs=pl.BlockSpec((Cout, tm), lambda m: (0, m)),
        compiler_params=_cparams(1, blk),
    )(w2, p, b2)
    return out[:, :M].reshape(Cout, Ho, Wo, N)


def conv2d_relu_pool2(act, w, b, num_tc):
    """3x3 valid conv + ReLU + 2x2 max-pool fused into one Pallas call.
    act: (Cin, H, W, N) bf16 -> (Cout, (H-2)//2, (W-2)//2, N) bf16."""
    Cout, Cin, kh, kw = w.shape
    _, H, W, N = act.shape
    Ho, Wo = H - kh + 1, W - kw + 1
    assert Ho % 2 == 0 and Wo % 2 == 0, "fused pool assumes even conv output"
    Hp, Wp = Ho // 2, Wo // 2
    Mq = Hp * Wp * N
    w2, b2, K, Kp = _prep_wb(w, b)
    tm, Mqp, steps = _m_tiling(Mq, num_tc, _M_TILE_CONV)

    # Quadrant (dh, dw): conv output at (2hp+dh, 2wp+dw) lands at lane
    # (hp*Wp + wp)*N + n of quadrant slab (dh, dw); lane ordering is identical
    # across quadrants, so the pool is a max over the four slabs.
    quads = []
    for dh in range(2):
        for dw in range(2):
            sl = [act[:, ki + dh:ki + dh + 2 * Hp - 1:2,
                          kj + dw:kj + dw + 2 * Wp - 1:2, :]
                  for ki in range(kh) for kj in range(kw)]
            q = jnp.stack(sl, axis=1).reshape(K, Mq)
            quads.append(jnp.pad(q, ((0, Kp - K), (0, Mqp - Mq))))
    p = jnp.stack(quads, axis=0)                    # (4, Kp, Mqp) bf16

    blk = (Cout * Kp * 2, 4 * Kp * tm * 2, Cout * 4, Cout * tm * 2)
    out = pl.pallas_call(
        _conv_pool_kernel,
        out_shape=jax.ShapeDtypeStruct((Cout, Mqp), jnp.bfloat16),
        grid=(steps,),
        in_specs=[pl.BlockSpec((Cout, Kp), lambda m: (0, 0)),
                  pl.BlockSpec((4, Kp, tm), lambda m: (0, 0, m)),
                  pl.BlockSpec((Cout, 1), lambda m: (0, 0))],
        out_specs=pl.BlockSpec((Cout, tm), lambda m: (0, m)),
        compiler_params=_cparams(1, blk),
    )(w2, p, b2)
    return out[:, :Mq].reshape(Cout, Hp, Wp, N)


def fc_head(x_cm, w1, b1, w2, b2, num_tc):
    """Fused fc1 + ReLU + fc2, channels-first.  x_cm: (2048, N) bf16; weights
    are in PyTorch nn.Linear layout (out_features, in_features)."""
    Kin, N = x_cm.shape
    H1 = w1.shape[0]
    Nout = w2.shape[0]
    tn, Np, steps = _m_tiling(N, num_tc, _M_TILE_FC)
    x = jnp.pad(x_cm, ((0, 0), (0, Np - N)))

    blk = (Kin * tn * 2, H1 * Kin * 2, H1 * 4, Nout * H1 * 2, Nout * 4,
           Nout * tn * 4)
    out = pl.pallas_call(
        _fc_kernel,
        out_shape=jax.ShapeDtypeStruct((Nout, Np), jnp.float32),
        grid=(steps,),
        in_specs=[pl.BlockSpec((Kin, tn), lambda n: (0, n)),
                  pl.BlockSpec((H1, Kin), lambda n: (0, 0)),
                  pl.BlockSpec((H1, 1), lambda n: (0, 0)),
                  pl.BlockSpec((Nout, H1), lambda n: (0, 0)),
                  pl.BlockSpec((Nout, 1), lambda n: (0, 0))],
        out_specs=pl.BlockSpec((Nout, tn), lambda n: (0, n)),
        compiler_params=_cparams(1, blk),
    )(x, w1.astype(jnp.bfloat16), b1.reshape(H1, 1).astype(jnp.float32),
      w2.astype(jnp.bfloat16), b2.reshape(Nout, 1).astype(jnp.float32))
    return out[:, :N].T                              # (N, 10) f32


# ---------------------------------------------------------------------------
# Parameters + forward
# ---------------------------------------------------------------------------
def init_params(key):
    def rnd(k, shape, scale=0.05):
        return scale * jax.random.normal(k, shape, jnp.float32)
    ks = jax.random.split(key, 12)
    return dict(
        conv1_w=rnd(ks[0], (8, 1, 3, 3)),    conv1_b=rnd(ks[1], (8,)),
        conv2_w=rnd(ks[2], (16, 8, 3, 3)),   conv2_b=rnd(ks[3], (16,)),
        conv3_w=rnd(ks[4], (16, 16, 3, 3)),  conv3_b=rnd(ks[5], (16,)),
        conv4_w=rnd(ks[6], (32, 16, 3, 3)),  conv4_b=rnd(ks[7], (32,)),
        # nn.Linear layout: (out_features, in_features); the 2048 axis follows
        # PyTorch's flatten order (c, h, w).
        fc1_w=rnd(ks[8], (64, 2048)),        fc1_b=rnd(ks[9], (64,)),
        fc2_w=rnd(ks[10], (10, 64)),         fc2_b=rnd(ks[11], (10,)),
    )


def net2_forward(params, x):
    # x: (N, 1, 28, 28) f32 NCHW (MNIST-sized; fc1 expects 32*8*8 = 2048).
    num_tc = _num_tensorcores()
    N = x.shape[0]
    # Channels-first, batch-LAST layout (C, H, W, N), bf16 from here on: every
    # im2col and the final flatten are pure slices + row-major reshapes.
    act = jnp.transpose(x, (1, 2, 3, 0)).astype(jnp.bfloat16)                 # (1, 28, 28, N)
    act = conv2d_relu(act, params["conv1_w"], params["conv1_b"], num_tc)      # (8, 26, 26, N)
    act = conv2d_relu_pool2(act, params["conv2_w"], params["conv2_b"], num_tc)  # (16, 12, 12, N)
    # TODO(synk): dropout1 / dropout2 are eval-mode identity (inference forward).
    act = conv2d_relu(act, params["conv3_w"], params["conv3_b"], num_tc)      # (16, 10, 10, N)
    act = conv2d_relu(act, params["conv4_w"], params["conv4_b"], num_tc)      # (32, 8, 8, N)
    x_cm = act.reshape(-1, N)                        # (2048, N): rows = PyTorch flatten order
    return fc_head(x_cm, params["fc1_w"], params["fc1_b"],
                   params["fc2_w"], params["fc2_b"], num_tc)                  # (N, 10) f32


if __name__ == "__main__":
    key = jax.random.PRNGKey(0)
    pkey, xkey = jax.random.split(key)
    params = init_params(pkey)
    x = jax.random.normal(xkey, (2, 1, 28, 28), jnp.float32)
    out = jax.jit(net2_forward)(params, x)
    out = jax.block_until_ready(out)
    assert out.shape == (2, 10) and out.dtype == jnp.float32
    print("KERNEL_OK")
</pallas_src>

<mosaic_0001>
module attributes {stable_mosaic.version = 11 : i64} {
  func.func @_conv_kernel(%arg0: i32, %arg1: memref<8x16xbf16, #tpu.memory_space<vmem>>, %arg2: memref<16x1408xbf16, #tpu.memory_space<vmem>>, %arg3: memref<8x1xf32, #tpu.memory_space<vmem>>, %arg4: memref<8x1408xbf16, #tpu.memory_space<vmem>>) attributes {dimension_semantics = [#tpu.dimension_semantics<parallel>], iteration_bounds = array<i64: 1>, scalar_prefetch = 0 : i64, scratch_operands = 0 : i64, tpu.core_type = #tpu.core_type<tc>, window_params = [{pipeline_mode = #tpu.pipeline_mode<synchronous>, transform_indices = @transform_0, window_bounds = array<i64: 8, 16>}, {transform_indices = @transform_1, window_bounds = array<i64: 16, 1408>}, {pipeline_mode = #tpu.pipeline_mode<synchronous>, transform_indices = @transform_2, window_bounds = array<i64: 8, 1>}, {transform_indices = @transform_3, window_bounds = array<i64: 8, 1408>}]} {
    %c0 = arith.constant 0 : index
    %c0_0 = arith.constant 0 : index
    %0 = vector.load %arg1[%c0, %c0_0] : memref<8x16xbf16, #tpu.memory_space<vmem>>, vector<8x16xbf16>
    %c0_1 = arith.constant 0 : index
    %c0_2 = arith.constant 0 : index
    %1 = vector.load %arg2[%c0_1, %c0_2] : memref<16x1408xbf16, #tpu.memory_space<vmem>>, vector<16x1408xbf16>
    %cst = arith.constant dense<0.000000e+00> : vector<8x1408xf32>
    %2 = tpu.matmul %0, %1, %cst {dimension_numbers = #tpu.dot_dimension_numbers<[1], [0], [0], [1], [0, 0, 1, 1], [], []>} : vector<8x16xbf16>, vector<16x1408xbf16>, vector<8x1408xf32> -> vector<8x1408xf32>
    %c0_3 = arith.constant 0 : index
    %c0_4 = arith.constant 0 : index
    %3 = vector.load %arg3[%c0_3, %c0_4] : memref<8x1xf32, #tpu.memory_space<vmem>>, vector<8x1xf32>
    %4 = vector.broadcast %3 : vector<8x1xf32> to vector<8x1408xf32>
    %5 = arith.addf %2, %4 : vector<8x1408xf32>
    %cst_5 = arith.constant 0.000000e+00 : f32
    %6 = vector.broadcast %cst_5 : f32 to vector<8x1408xf32>
    %7 = arith.maximumf %5, %6 : vector<8x1408xf32>
    %8 = arith.truncf %7 : vector<8x1408xf32> to vector<8x1408xbf16>
    %c0_6 = arith.constant 0 : index
    %c0_7 = arith.constant 0 : index
    %9 = vector.load %arg4[%c0_6, %c0_7] : memref<8x1408xbf16, #tpu.memory_space<vmem>>, vector<8x1408xbf16>
    tpu.vector_store %arg4[%c0_6, %c0_7], %8 {strides = array<i32>} : memref<8x1408xbf16, #tpu.memory_space<vmem>>, vector<8x1408xbf16>,
    return
  }
  func.func @transform_0(%arg0: i32) -> (i32, i32) {
    %c0_i32 = arith.constant 0 : i32
    %c0_i32_0 = arith.constant 0 : i32
    %c0_i32_1 = arith.constant 0 : i32
    return %c0_i32, %c0_i32_0 : i32, i32
  }
  func.func @transform_1(%arg0: i32) -> (i32, i32) {
    %c0_i32 = arith.constant 0 : i32
    %c0_i32_0 = arith.constant 0 : i32
    return %c0_i32, %arg0 : i32, i32
  }
  func.func @transform_2(%arg0: i32) -> (i32, i32) {
    %c0_i32 = arith.constant 0 : i32
    %c0_i32_0 = arith.constant 0 : i32
    %c0_i32_1 = arith.constant 0 : i32
    return %c0_i32, %c0_i32_0 : i32, i32
  }
  func.func @transform_3(%arg0: i32) -> (i32, i32) {
    %c0_i32 = arith.constant 0 : i32
    %c0_i32_0 = arith.constant 0 : i32
    return %c0_i32, %arg0 : i32, i32
  }
}

module attributes {stable_mosaic.version = 11 : i64} {
  func.func @_conv_pool_kernel(%arg0: i32, %arg1: memref<16x80xbf16, #tpu.memory_space<vmem>>, %arg2: memref<4x80x384xbf16, #tpu.memory_space<vmem>>, %arg3: memref<16x1xf32, #tpu.memory_space<vmem>>, %arg4: memref<16x384xbf16, #tpu.memory_space<vmem>>) attributes {dimension_semantics = [#tpu.dimension_semantics<parallel>], iteration_bounds = array<i64: 1>, scalar_prefetch = 0 : i64, scratch_operands = 0 : i64, tpu.core_type = #tpu.core_type<tc>, window_params = [{pipeline_mode = #tpu.pipeline_mode<synchronous>, transform_indices = @transform_0, window_bounds = array<i64: 16, 80>}, {transform_indices = @transform_1, window_bounds = array<i64: 4, 80, 384>}, {pipeline_mode = #tpu.pipeline_mode<synchronous>, transform_indices = @transform_2, window_bounds = array<i64: 16, 1>}, {transform_indices = @transform_3, window_bounds = array<i64: 16, 384>}]} {
    %c0 = arith.constant 0 : index
    %c0_0 = arith.constant 0 : index
    %0 = vector.load %arg1[%c0, %c0_0] : memref<16x80xbf16, #tpu.memory_space<vmem>>, vector<16x80xbf16>
    %c0_1 = arith.constant 0 : index
    %c0_2 = arith.constant 0 : index
    %c0_3 = arith.constant 0 : index
    %1 = vector.load %arg2[%c0_1, %c0_2, %c0_3] : memref<4x80x384xbf16, #tpu.memory_space<vmem>>, vector<1x80x384xbf16>
    %2 = vector.shape_cast %1 : vector<1x80x384xbf16> to vector<80x384xbf16>
    %cst = arith.constant dense<0.000000e+00> : vector<16x384xf32>
    %3 = tpu.matmul %0, %2, %cst {dimension_numbers = #tpu.dot_dimension_numbers<[1], [0], [0], [1], [0, 0, 1, 1], [], []>} : vector<16x80xbf16>, vector<80x384xbf16>, vector<16x384xf32> -> vector<16x384xf32>
    %c1 = arith.constant 1 : index
    %c0_4 = arith.constant 0 : index
    %c0_5 = arith.constant 0 : index
    %4 = vector.load %arg2[%c1, %c0_4, %c0_5] : memref<4x80x384xbf16, #tpu.memory_space<vmem>>, vector<1x80x384xbf16>
    %5 = vector.shape_cast %4 : vector<1x80x384xbf16> to vector<80x384xbf16>
    %cst_6 = arith.constant dense<0.000000e+00> : vector<16x384xf32>
    %6 = tpu.matmul %0, %5, %cst_6 {dimension_numbers = #tpu.dot_dimension_numbers<[1], [0], [0], [1], [0, 0, 1, 1], [], []>} : vector<16x80xbf16>, vector<80x384xbf16>, vector<16x384xf32> -> vector<16x384xf32>
    %c2 = arith.constant 2 : index
    %c0_7 = arith.constant 0 : index
    %c0_8 = arith.constant 0 : index
    %7 = vector.load %arg2[%c2, %c0_7, %c0_8] : memref<4x80x384xbf16, #tpu.memory_space<vmem>>, vector<1x80x384xbf16>
    %8 = vector.shape_cast %7 : vector<1x80x384xbf16> to vector<80x384xbf16>
    %cst_9 = arith.constant dense<0.000000e+00> : vector<16x384xf32>
    %9 = tpu.matmul %0, %8, %cst_9 {dimension_numbers = #tpu.dot_dimension_numbers<[1], [0], [0], [1], [0, 0, 1, 1], [], []>} : vector<16x80xbf16>, vector<80x384xbf16>, vector<16x384xf32> -> vector<16x384xf32>
    %c3 = arith.constant 3 : index
    %c0_10 = arith.constant 0 : index
    %c0_11 = arith.constant 0 : index
    %10 = vector.load %arg2[%c3, %c0_10, %c0_11] : memref<4x80x384xbf16, #tpu.memory_space<vmem>>, vector<1x80x384xbf16>
    %11 = vector.shape_cast %10 : vector<1x80x384xbf16> to vector<80x384xbf16>
    %cst_12 = arith.constant dense<0.000000e+00> : vector<16x384xf32>
    %12 = tpu.matmul %0, %11, %cst_12 {dimension_numbers = #tpu.dot_dimension_numbers<[1], [0], [0], [1], [0, 0, 1, 1], [], []>} : vector<16x80xbf16>, vector<80x384xbf16>, vector<16x384xf32> -> vector<16x384xf32>
    %13 = arith.maximumf %3, %6 : vector<16x384xf32>
    %14 = arith.maximumf %9, %12 : vector<16x384xf32>
    %15 = arith.maximumf %13, %14 : vector<16x384xf32>
    %c0_13 = arith.constant 0 : index
    %c0_14 = arith.constant 0 : index
    %16 = vector.load %arg3[%c0_13, %c0_14] : memref<16x1xf32, #tpu.memory_space<vmem>>, vector<16x1xf32>
    %17 = vector.broadcast %16 : vector<16x1xf32> to vector<16x384xf32>
    %18 = arith.addf %15, %17 : vector<16x384xf32>
    %cst_15 = arith.constant 0.000000e+00 : f32
    %19 = vector.broadcast %cst_15 : f32 to vector<16x384xf32>
    %20 = arith.maximumf %18, %19 : vector<16x384xf32>
    %21 = arith.truncf %20 : vector<16x384xf32> to vector<16x384xbf16>
    %c0_16 = arith.constant 0 : index
    %c0_17 = arith.constant 0 : index
    %22 = vector.load %arg4[%c0_16, %c0_17] : memref<16x384xbf16, #tpu.memory_space<vmem>>, vector<16x384xbf16>
    tpu.vector_store %arg4[%c0_16, %c0_17], %21 {strides = array<i32>} : memref<16x384xbf16, #tpu.memory_space<vmem>>, vector<16x384xbf16>,
    return
  }
  func.func @transform_0(%arg0: i32) -> (i32, i32) {
    %c0_i32 = arith.constant 0 : i32
    %c0_i32_0 = arith.constant 0 : i32
    %c0_i32_1 = arith.constant 0 : i32
    return %c0_i32, %c0_i32_0 : i32, i32
  }
  func.func @transform_1(%arg0: i32) -> (i32, i32, i32) {
    %c0_i32 = arith.constant 0 : i32
    %c0_i32_0 = arith.constant 0 : i32
    %c0_i32_1 = arith.constant 0 : i32
    return %c0_i32, %c0_i32_0, %arg0 : i32, i32, i32
  }
  func.func @transform_2(%arg0: i32) -> (i32, i32) {
    %c0_i32 = arith.constant 0 : i32
    %c0_i32_0 = arith.constant 0 : i32
    %c0_i32_1 = arith.constant 0 : i32
    return %c0_i32, %c0_i32_0 : i32, i32
  }
  func.func @transform_3(%arg0: i32) -> (i32, i32) {
    %c0_i32 = arith.constant 0 : i32
    %c0_i32_0 = arith.constant 0 : i32
    return %c0_i32, %arg0 : i32, i32
  }
}

module attributes {stable_mosaic.version = 11 : i64} {
  func.func @_conv_kernel(%arg0: i32, %arg1: memref<16x144xbf16, #tpu.memory_space<vmem>>, %arg2: memref<144x256xbf16, #tpu.memory_space<vmem>>, %arg3: memref<16x1xf32, #tpu.memory_space<vmem>>, %arg4: memref<16x256xbf16, #tpu.memory_space<vmem>>) attributes {dimension_semantics = [#tpu.dimension_semantics<parallel>], iteration_bounds = array<i64: 1>, scalar_prefetch = 0 : i64, scratch_operands = 0 : i64, tpu.core_type = #tpu.core_type<tc>, window_params = [{pipeline_mode = #tpu.pipeline_mode<synchronous>, transform_indices = @transform_0, window_bounds = array<i64: 16, 144>}, {transform_indices = @transform_1, window_bounds = array<i64: 144, 256>}, {pipeline_mode = #tpu.pipeline_mode<synchronous>, transform_indices = @transform_2, window_bounds = array<i64: 16, 1>}, {transform_indices = @transform_3, window_bounds = array<i64: 16, 256>}]} {
    %c0 = arith.constant 0 : index
    %c0_0 = arith.constant 0 : index
    %0 = vector.load %arg1[%c0, %c0_0] : memref<16x144xbf16, #tpu.memory_space<vmem>>, vector<16x144xbf16>
    %c0_1 = arith.constant 0 : index
    %c0_2 = arith.constant 0 : index
    %1 = vector.load %arg2[%c0_1, %c0_2] : memref<144x256xbf16, #tpu.memory_space<vmem>>, vector<144x256xbf16>
    %cst = arith.constant dense<0.000000e+00> : vector<16x256xf32>
    %2 = tpu.matmul %0, %1, %cst {dimension_numbers = #tpu.dot_dimension_numbers<[1], [0], [0], [1], [0, 0, 1, 1], [], []>} : vector<16x144xbf16>, vector<144x256xbf16>, vector<16x256xf32> -> vector<16x256xf32>
    %c0_3 = arith.constant 0 : index
    %c0_4 = arith.constant 0 : index
    %3 = vector.load %arg3[%c0_3, %c0_4] : memref<16x1xf32, #tpu.memory_space<vmem>>, vector<16x1xf32>
    %4 = vector.broadcast %3 : vector<16x1xf32> to vector<16x256xf32>
    %5 = arith.addf %2, %4 : vector<16x256xf32>
    %cst_5 = arith.constant 0.000000e+00 : f32
    %6 = vector.broadcast %cst_5 : f32 to vector<16x256xf32>
    %7 = arith.maximumf %5, %6 : vector<16x256xf32>
    %8 = arith.truncf %7 : vector<16x256xf32> to vector<16x256xbf16>
    %c0_6 = arith.constant 0 : index
    %c0_7 = arith.constant 0 : index
    %9 = vector.load %arg4[%c0_6, %c0_7] : memref<16x256xbf16, #tpu.memory_space<vmem>>, vector<16x256xbf16>
    tpu.vector_store %arg4[%c0_6, %c0_7], %8 {strides = array<i32>} : memref<16x256xbf16, #tpu.memory_space<vmem>>, vector<16x256xbf16>,
    return
  }
  func.func @transform_0(%arg0: i32) -> (i32, i32) {
    %c0_i32 = arith.constant 0 : i32
    %c0_i32_0 = arith.constant 0 : i32
    %c0_i32_1 = arith.constant 0 : i32
    return %c0_i32, %c0_i32_0 : i32, i32
  }
  func.func @transform_1(%arg0: i32) -> (i32, i32) {
    %c0_i32 = arith.constant 0 : i32
    %c0_i32_0 = arith.constant 0 : i32
    return %c0_i32, %arg0 : i32, i32
  }
  func.func @transform_2(%arg0: i32) -> (i32, i32) {
    %c0_i32 = arith.constant 0 : i32
    %c0_i32_0 = arith.constant 0 : i32
    %c0_i32_1 = arith.constant 0 : i32
    return %c0_i32, %c0_i32_0 : i32, i32
  }
  func.func @transform_3(%arg0: i32) -> (i32, i32) {
    %c0_i32 = arith.constant 0 : i32
    %c0_i32_0 = arith.constant 0 : i32
    return %c0_i32, %arg0 : i32, i32
  }
}

module attributes {stable_mosaic.version = 11 : i64} {
  func.func @_conv_kernel(%arg0: i32, %arg1: memref<32x144xbf16, #tpu.memory_space<vmem>>, %arg2: memref<144x128xbf16, #tpu.memory_space<vmem>>, %arg3: memref<32x1xf32, #tpu.memory_space<vmem>>, %arg4: memref<32x128xbf16, #tpu.memory_space<vmem>>) attributes {dimension_semantics = [#tpu.dimension_semantics<parallel>], iteration_bounds = array<i64: 1>, scalar_prefetch = 0 : i64, scratch_operands = 0 : i64, tpu.core_type = #tpu.core_type<tc>, window_params = [{pipeline_mode = #tpu.pipeline_mode<synchronous>, transform_indices = @transform_0, window_bounds = array<i64: 32, 144>}, {transform_indices = @transform_1, window_bounds = array<i64: 144, 128>}, {pipeline_mode = #tpu.pipeline_mode<synchronous>, transform_indices = @transform_2, window_bounds = array<i64: 32, 1>}, {transform_indices = @transform_3, window_bounds = array<i64: 32, 128>}]} {
    %c0 = arith.constant 0 : index
    %c0_0 = arith.constant 0 : index
    %0 = vector.load %arg1[%c0, %c0_0] : memref<32x144xbf16, #tpu.memory_space<vmem>>, vector<32x144xbf16>
    %c0_1 = arith.constant 0 : index
    %c0_2 = arith.constant 0 : index
    %1 = vector.load %arg2[%c0_1, %c0_2] : memref<144x128xbf16, #tpu.memory_space<vmem>>, vector<144x128xbf16>
    %cst = arith.constant dense<0.000000e+00> : vector<32x128xf32>
    %2 = tpu.matmul %0, %1, %cst {dimension_numbers = #tpu.dot_dimension_numbers<[1], [0], [0], [1], [0, 0, 1, 1], [], []>} : vector<32x144xbf16>, vector<144x128xbf16>, vector<32x128xf32> -> vector<32x128xf32>
    %c0_3 = arith.constant 0 : index
    %c0_4 = arith.constant 0 : index
    %3 = vector.load %arg3[%c0_3, %c0_4] : memref<32x1xf32, #tpu.memory_space<vmem>>, vector<32x1xf32>
    %4 = vector.broadcast %3 : vector<32x1xf32> to vector<32x128xf32>
    %5 = arith.addf %2, %4 : vector<32x128xf32>
    %cst_5 = arith.constant 0.000000e+00 : f32
    %6 = vector.broadcast %cst_5 : f32 to vector<32x128xf32>
    %7 = arith.maximumf %5, %6 : vector<32x128xf32>
    %8 = arith.truncf %7 : vector<32x128xf32> to vector<32x128xbf16>
    %c0_6 = arith.constant 0 : index
    %c0_7 = arith.constant 0 : index
    %9 = vector.load %arg4[%c0_6, %c0_7] : memref<32x128xbf16, #tpu.memory_space<vmem>>, vector<32x128xbf16>
    tpu.vector_store %arg4[%c0_6, %c0_7], %8 {strides = array<i32>} : memref<32x128xbf16, #tpu.memory_space<vmem>>, vector<32x128xbf16>,
    return
  }
  func.func @transform_0(%arg0: i32) -> (i32, i32) {
    %c0_i32 = arith.constant 0 : i32
    %c0_i32_0 = arith.constant 0 : i32
    %c0_i32_1 = arith.constant 0 : i32
    return %c0_i32, %c0_i32_0 : i32, i32
  }
  func.func @transform_1(%arg0: i32) -> (i32, i32) {
    %c0_i32 = arith.constant 0 : i32
    %c0_i32_0 = arith.constant 0 : i32
    return %c0_i32, %arg0 : i32, i32
  }
  func.func @transform_2(%arg0: i32) -> (i32, i32) {
    %c0_i32 = arith.constant 0 : i32
    %c0_i32_0 = arith.constant 0 : i32
    %c0_i32_1 = arith.constant 0 : i32
    return %c0_i32, %c0_i32_0 : i32, i32
  }
  func.func @transform_3(%arg0: i32) -> (i32, i32) {
    %c0_i32 = arith.constant 0 : i32
    %c0_i32_0 = arith.constant 0 : i32
    return %c0_i32, %arg0 : i32, i32
  }
}

module attributes {stable_mosaic.version = 11 : i64} {
  func.func @_fc_kernel(%arg0: i32, %arg1: memref<2048x128xbf16, #tpu.memory_space<vmem>>, %arg2: memref<64x2048xbf16, #tpu.memory_space<vmem>>, %arg3: memref<64x1xf32, #tpu.memory_space<vmem>>, %arg4: memref<10x64xbf16, #tpu.memory_space<vmem>>, %arg5: memref<10x1xf32, #tpu.memory_space<vmem>>, %arg6: memref<10x128xf32, #tpu.memory_space<vmem>>) attributes {dimension_semantics = [#tpu.dimension_semantics<parallel>], iteration_bounds = array<i64: 1>, scalar_prefetch = 0 : i64, scratch_operands = 0 : i64, tpu.core_type = #tpu.core_type<tc>, window_params = [{transform_indices = @transform_0, window_bounds = array<i64: 2048, 128>}, {pipeline_mode = #tpu.pipeline_mode<synchronous>, transform_indices = @transform_1, window_bounds = array<i64: 64, 2048>}, {pipeline_mode = #tpu.pipeline_mode<synchronous>, transform_indices = @transform_2, window_bounds = array<i64: 64, 1>}, {pipeline_mode = #tpu.pipeline_mode<synchronous>, transform_indices = @transform_3, window_bounds = array<i64: 10, 64>}, {pipeline_mode = #tpu.pipeline_mode<synchronous>, transform_indices = @transform_4, window_bounds = array<i64: 10, 1>}, {transform_indices = @transform_5, window_bounds = array<i64: 10, 128>}]} {
    %c0 = arith.constant 0 : index
    %c0_0 = arith.constant 0 : index
    %0 = vector.load %arg2[%c0, %c0_0] : memref<64x2048xbf16, #tpu.memory_space<vmem>>, vector<64x2048xbf16>
    %c0_1 = arith.constant 0 : index
    %c0_2 = arith.constant 0 : index
    %1 = vector.load %arg1[%c0_1, %c0_2] : memref<2048x128xbf16, #tpu.memory_space<vmem>>, vector<2048x128xbf16>
    %cst = arith.constant dense<0.000000e+00> : vector<64x128xf32>
    %2 = tpu.matmul %0, %1, %cst {dimension_numbers = #tpu.dot_dimension_numbers<[1], [0], [0], [1], [0, 0, 1, 1], [], []>} : vector<64x2048xbf16>, vector<2048x128xbf16>, vector<64x128xf32> -> vector<64x128xf32>
    %c0_3 = arith.constant 0 : index
    %c0_4 = arith.constant 0 : index
    %3 = vector.load %arg3[%c0_3, %c0_4] : memref<64x1xf32, #tpu.memory_space<vmem>>, vector<64x1xf32>
    %4 = vector.broadcast %3 : vector<64x1xf32> to vector<64x128xf32>
    %5 = arith.addf %2, %4 : vector<64x128xf32>
    %cst_5 = arith.constant 0.000000e+00 : f32
    %6 = vector.broadcast %cst_5 : f32 to vector<64x128xf32>
    %7 = arith.maximumf %5, %6 : vector<64x128xf32>
    %c0_6 = arith.constant 0 : index
    %c0_7 = arith.constant 0 : index
    %8 = vector.load %arg4[%c0_6, %c0_7] : memref<10x64xbf16, #tpu.memory_space<vmem>>, vector<10x64xbf16>
    %9 = arith.truncf %7 : vector<64x128xf32> to vector<64x128xbf16>
    %cst_8 = arith.constant dense<0.000000e+00> : vector<10x128xf32>
    %10 = tpu.matmul %8, %9, %cst_8 {dimension_numbers = #tpu.dot_dimension_numbers<[1], [0], [0], [1], [0, 0, 1, 1], [], []>} : vector<10x64xbf16>, vector<64x128xbf16>, vector<10x128xf32> -> vector<10x128xf32>
    %c0_9 = arith.constant 0 : index
    %c0_10 = arith.constant 0 : index
    %11 = vector.load %arg5[%c0_9, %c0_10] : memref<10x1xf32, #tpu.memory_space<vmem>>, vector<10x1xf32>
    %12 = vector.broadcast %11 : vector<10x1xf32> to vector<10x128xf32>
    %13 = arith.addf %10, %12 : vector<10x128xf32>
    %c0_11 = arith.constant 0 : index
    %c0_12 = arith.constant 0 : index
    %14 = vector.load %arg6[%c0_11, %c0_12] : memref<10x128xf32, #tpu.memory_space<vmem>>, vector<10x128xf32>
    tpu.vector_store %arg6[%c0_11, %c0_12], %13 {strides = array<i32>} : memref<10x128xf32, #tpu.memory_space<vmem>>, vector<10x128xf32>,
    return
  }
  func.func @transform_0(%arg0: i32) -> (i32, i32) {
    %c0_i32 = arith.constant 0 : i32
    %c0_i32_0 = arith.constant 0 : i32
    return %c0_i32, %arg0 : i32, i32
  }
  func.func @transform_1(%arg0: i32) -> (i32, i32) {
    %c0_i32 = arith.constant 0 : i32
    %c0_i32_0 = arith.constant 0 : i32
    %c0_i32_1 = arith.constant 0 : i32
    return %c0_i32, %c0_i32_0 : i32, i32
  }
  func.func @transform_2(%arg0: i32) -> (i32, i32) {
    %c0_i32 = arith.constant 0 : i32
    %c0_i32_0 = arith.constant 0 : i32
    %c0_i32_1 = arith.constant 0 : i32
    return %c0_i32, %c0_i32_0 : i32, i32
  }
  func.func @transform_3(%arg0: i32) -> (i32, i32) {
    %c0_i32 = arith.constant 0 : i32
    %c0_i32_0 = arith.constant 0 : i32
    %c0_i32_1 = arith.constant 0 : i32
    return %c0_i32, %c0_i32_0 : i32, i32
  }
  func.func @transform_4(%arg0: i32) -> (i32, i32) {
    %c0_i32 = arith.constant 0 : i32
    %c0_i32_0 = arith.constant 0 : i32
    %c0_i32_1 = arith.constant 0 : i32
    return %c0_i32, %c0_i32_0 : i32, i32
  }
  func.func @transform_5(%arg0: i32) -> (i32, i32) {
    %c0_i32 = arith.constant 0 : i32
    %c0_i32_0 = arith.constant 0 : i32
    return %c0_i32, %arg0 : i32, i32
  }
}

</mosaic_0001>

<bundles_post_ra>
// kernel: net2_forward.5
= control target key start
LH: loop header
LB: loop body
LE: loop exit
PB: predicated region body
PF: predicated region fallthrough
CT: control target
= control target key end

     0   :  { %vm90_vm0 = vcmask 130048   ;;  %v332_v3 = vmov 0   ;;  %s454_s1 = inlined_call_operand.vmem [shape: bf16[16,1408], index: 1, kind: input, shape index: {}]   ;;  %s455_s0 = inlined_call_operand.vmem [shape: bf16[8,16], index: 0, kind: input, shape index: {}]   ;;  %s456_s2 = inlined_call_operand.vmem [shape: f32[8,1], index: 2, kind: input, shape index: {}]   ;;  %s457_s3 = inlined_call_operand.vmem [shape: bf16[8,1408], index: 3, kind: output, shape index: {}]  }
   0x1   :  { %v266_v0 = vld [vmem:[%s454_s1] sm:$0xf]  ;;  %v324_v1 = vld [vmem:[%s454_s1 + $0x28] sm:$0xf0]  ;;  %v319_v2 = vld [vmem:[%s454_s1 + $0x4] sm:$0xf]  ;;  %331 = vset.pattern.permute.xlu0 %v332_v3 }
   0x2   :  { %v267_v4 = vor.u32 %v324_v1, %v266_v0  ;;  %v268_v5 = vld [vmem:[%s454_s1 + $0x2c] sm:$0xf0]  ;;  %v274_v6 = vld [vmem:[%s454_s1 + $0x8] sm:$0xf]  ;;  %v325_v7 = vld [vmem:[%s454_s1 + $0x30] sm:$0xf0] }
   0x3   :  { %v271_v8 = vor.u32 %v319_v2, %v268_v5  ;;  %v275_v9 = vor.u32 %v325_v7, %v274_v6  ;;  %v320_v10 = vld [vmem:[%s454_s1 + $0xc] sm:$0xf]  ;;  %v276_v11 = vld [vmem:[%s454_s1 + $0x34] sm:$0xf0]  ;;  %v15_v12 = vld [vmem:[%s455_s0] sm:$0xf] }
   0x4   :  { %101 = vmatpush.bf16.msra.mxu0 %v267_v4  ;;  %v279_v13 = vor.u32 %v320_v10, %v276_v11  ;;  %v290_v14 = vld [vmem:[%s454_s1 + $0x18] sm:$0xf]  ;;  %v327_v15 = vld [vmem:[%s454_s1 + $0x40] sm:$0xf0]  ;;  %v282_v16 = vld [vmem:[%s454_s1 + $0x10] sm:$0xf] }
   0x5   :  { %114 = vmatpush.bf16.msra.mxu1 %v271_v8  ;;  %127 = vmatpush.bf16.msra.mxu2 %v275_v9  ;;  %v291_v17 = vor.u32 %v327_v15, %v290_v14  ;;  %v326_v18 = vld [vmem:[%s454_s1 + $0x38] sm:$0xf0]  ;;  %v321_v19 = vld [vmem:[%s454_s1 + $0x14] sm:$0xf]  ;;  %v284_v20 = vld [vmem:[%s454_s1 + $0x3c] sm:$0xf0] }
   0x6   :  { %140 = vmatpush.bf16.msra.mxu3 %v279_v13  ;;  %v283_v21 = vor.u32 %v326_v18, %v282_v16  ;;  %v287_v22 = vor.u32 %v321_v19, %v284_v20  ;;  %v322_v23 = vld [vmem:[%s454_s1 + $0x1c] sm:$0xf]  ;;  %v292_v24 = vld [vmem:[%s454_s1 + $0x44] sm:$0xf0]  ;;  %v329_v27 = vld [vmem:[%s454_s1 + $0x50] sm:$0xf0] }
   0x7   :  { %v306_v25 = vld [vmem:[%s454_s1 + $0x28] sm:$0xf]  ;;  %308 = vmatmul.msk.bf16.vlgmr.msra.gmra.mxu0 %vm90_vm0, %v15_v12  ;;  %v295_v26 = vor.u32 %v322_v23, %v292_v24  ;;  %v28_v28 = vld [vmem:[%s456_s2] sm:$0xff]  ;;  %v328_v31 = vld [vmem:[%s454_s1 + $0x48] sm:$0xf0] }
   0x8   :  { %v298_v29 = vld [vmem:[%s454_s1 + $0x20] sm:$0xf]  ;;  %309 = vmatmul.msk.bf16.vlgmr.msra.gmra.mxu1 %vm90_vm0, %v15_v12  ;;  %310 = vmatmul.msk.bf16.vlgmr.msra.gmra.mxu2 %vm90_vm0, %v15_v12  ;;  %v307_v30 = vor.u32 %v329_v27, %v306_v25  ;;  %v323_v32 = vld [vmem:[%s454_s1 + $0x24] sm:$0xf]  ;;  %v300_v33 = vld [vmem:[%s454_s1 + $0x4c] sm:$0xf0] }
   0x9   :  { %179 = vmatpush.bf16.msrb.mxu2 %v291_v17  ;;  %311 = vmatmul.msk.bf16.vlgmr.msra.gmra.mxu3 %vm90_vm0, %v15_v12  ;;  %v299_v34 = vor.u32 %v328_v31, %v298_v29  ;;  %v303_v35 = vor.u32 %v323_v32, %v300_v33 }
   0xa   :  { %153 = vmatpush.bf16.msrb.mxu0 %v283_v21  ;;  %166 = vmatpush.bf16.msrb.mxu1 %v287_v22 }
   0xb   :  { %192 = vmatpush.bf16.msrb.mxu3 %v295_v26  ;;  %31 = vperm.xlu0 %331, %v28_v28  }
   0xd   :  { %231 = vmatpush.bf16.msra.mxu2 %v307_v30 }
   0xe   :  { %205 = vmatpush.bf16.msra.mxu0 %v299_v34  ;;  %218 = vmatpush.bf16.msra.mxu1 %v303_v35 }
  0x17   :  { %312 = vmatmul.msk.bf16.vlgmr.msrb.gmra.mxu0 %vm90_vm0, %v15_v12 }
  0x18   :  { %313 = vmatmul.msk.bf16.vlgmr.msrb.gmra.mxu1 %vm90_vm0, %v15_v12  ;;  %314 = vmatmul.msk.bf16.vlgmr.msrb.gmra.mxu2 %vm90_vm0, %v15_v12 }
  0x19   :  { %315 = vmatmul.msk.bf16.vlgmr.msrb.gmra.mxu3 %vm90_vm0, %v15_v12 }
  0x27   :  { %316 = vmatmul.msk.bf16.vlgmr.msra.gmra.mxu0 %vm90_vm0, %v15_v12 }
  0x28   :  { %317 = vmatmul.msk.bf16.vlgmr.msra.gmra.mxu1 %vm90_vm0, %v15_v12  ;;  %318 = vmatmul.msk.bf16.vlgmr.msra.gmra.mxu2 %vm90_vm0, %v15_v12 }
  0x7d   :  { %v32_v36 = vpop.permute.xlu0 %31 }
  0x84   :  { %v103_v37 = vpop.f32.mrf.mxu0 }
  0x85   :  { %v116_v38 = vpop.f32.mrf.mxu1  ;;  %v104_v39 = vadd.f32 %v103_v37, %v32_v36 }
  0x86   :  { %v117_v40 = vadd.f32 %v116_v38, %v32_v36 }
  0x87   :  { %v237_v41 = vmax.f32 %v104_v39, 0.0 }
  0x88   :  { %v238_v42 = vmax.f32 %v117_v40, 0.0 }
  0x8a   :  { %v248_v43 = vpack.c.bf16 %v238_v42, %v237_v41 }
  0x8b   :  { %v129_v44 = vpop.f32.mrf.mxu2 }
  0x8c   :  { %v130_v45 = vadd.f32 %v129_v44, %v32_v36  ;;  %v142_v46 = vpop.f32.mrf.mxu3  ;;  %254 = vst [vmem:[%s457_s3] sm:$0xff] %v248_v43  ;;  %v105_v47 = vpop.f32.mrf.mxu0 }
  0x8d   :  { %v143_v48 = vadd.f32 %v142_v46, %v32_v36  ;;  %v118_v49 = vpop.f32.mrf.mxu1 }
  0x8e   :  { %v239_v50 = vmax.f32 %v130_v45, 0.0 }
  0x8f   :  { %v240_v51 = vmax.f32 %v143_v48, 0.0 }
  0x91   :  { %v249_v52 = vpack.c.bf16 %v240_v51, %v239_v50 }
  0x93   :  { %255 = vst [vmem:[%s457_s3 + $0x8] sm:$0xff] %v249_v52  ;;  %v131_v53 = vpop.f32.mrf.mxu2 }
  0x94   :  { %v144_v54 = vpop.f32.mrf.mxu3  ;;  %v155_v55 = vpop.f32.mrf.mxu0 }
  0x95   :  { %v156_v56 = vadd.f32 %v155_v55, %v32_v36  ;;  %v168_v57 = vpop.f32.mrf.mxu1 }
  0x96   :  { %v169_v58 = vadd.f32 %v168_v57, %v32_v36 }
  0x97   :  { %v241_v59 = vmax.f32 %v156_v56, 0.0 }
  0x98   :  { %v242_v60 = vmax.f32 %v169_v58, 0.0 }
  0x9a   :  { %v250_v61 = vpack.c.bf16 %v242_v60, %v241_v59 }
  0x9b   :  { %v181_v62 = vpop.f32.mrf.mxu2 }
  0x9c   :  { %256 = vst [vmem:[%s457_s3 + $0x10] sm:$0xff] %v250_v61  ;;  %v182_v63 = vadd.f32 %v181_v62, %v32_v36  ;;  %v194_v0 = vpop.f32.mrf.mxu3  ;;  %v157_v1 = vpop.f32.mrf.mxu0 }
  0x9d   :  { %v195_v2 = vadd.f32 %v194_v0, %v32_v36  ;;  %v170_v3 = vpop.f32.mrf.mxu1 }
  0x9e   :  { %v243_v4 = vmax.f32 %v182_v63, 0.0 }
  0x9f   :  { %v244_v5 = vmax.f32 %v195_v2, 0.0 }
  0xa1   :  { %v251_v6 = vpack.c.bf16 %v244_v5, %v243_v4 }
  0xa3   :  { %257 = vst [vmem:[%s457_s3 + $0x18] sm:$0xff] %v251_v6  ;;  %v183_v7 = vpop.f32.mrf.mxu2 }
  0xa4   :  { %v207_v8 = vpop.f32.mrf.mxu0  ;;  %v196_v9 = vpop.f32.mrf.mxu3 }
  0xa5   :  { %v208_v10 = vadd.f32 %v207_v8, %v32_v36  ;;  %v220_v11 = vpop.f32.mrf.mxu1 }
  0xa6   :  { %v221_v12 = vadd.f32 %v220_v11, %v32_v36 }
  0xa7   :  { %v245_v13 = vmax.f32 %v208_v10, 0.0 }
  0xa8   :  { %v246_v14 = vmax.f32 %v221_v12, 0.0 }
  0xaa   :  { %v252_v15 = vpack.c.bf16 %v246_v14, %v245_v13 }
  0xab   :  { %v233_v16 = vpop.f32.mrf.mxu2 }
  0xac   :  { %258 = vst [vmem:[%s457_s3 + $0x20] sm:$0xff] %v252_v15  ;;  %v234_v17 = vadd.f32 %v233_v16, %v32_v36  ;;  %v209_v18 = vpop.f32.mrf.mxu0 }
  0xad   :  { %v222_v19 = vpop.f32.mrf.mxu1 }
  0xae   :  { %v247_v20 = vmax.f32 %v234_v17, 0.0 }
  0xb0   :  { %v253_v21 = vpack.c.bf16 %v247_v20, %v247_v20 }
  0xb2   :  { %259 = vst [vmem:[%s457_s3 + $0x28] sm:$0xf] %v253_v21 }
  0xb3   :  { %v235_v22 = vpop.f32.mrf.mxu2 }

// kernel: net2_forward.6
= control target key start
LH: loop header
LB: loop body
LE: loop exit
PB: predicated region body
PF: predicated region fallthrough
CT: control target
= control target key end

     0   :  { %vm122_vm0 = vcmask 654336   ;;  %s1458_s1 = inlined_call_operand.vmem [shape: bf16[4,80,384], index: 1, kind: input, shape index: {}]   ;;  %s1459_s0 = inlined_call_operand.vmem [shape: bf16[16,80], index: 0, kind: input, shape index: {}]   ;;  %s1460_s2 = inlined_call_operand.vmem [shape: f32[16,1], index: 2, kind: input, shape index: {}]   ;;  %s1461_s3 = inlined_call_operand.vmem [shape: bf16[16,384], index: 3, kind: output, shape index: {}]  }
   0x1   :  { %v705_v0 = vld [vmem:[%s1458_s1 + $0x60] sm:$0xf]  ;;  %v981_v1 = vld [vmem:[%s1458_s1 + $0x68] sm:$0xf0]  ;;  %v980_v2 = vld [vmem:[%s1458_s1 + $0x64] sm:$0xf] }
   0x2   :  { %v706_v3 = vor.u32 %v981_v1, %v705_v0  ;;  %v707_v4 = vld [vmem:[%s1458_s1 + $0x6c] sm:$0xf0]  ;;  %v713_v5 = vld [vmem:[%s1458_s1 + $0x68] sm:$0xf]  ;;  %v982_v6 = vld [vmem:[%s1458_s1 + $0x70] sm:$0xf0] }
   0x3   :  { %v710_v7 = vor.u32 %v980_v2, %v707_v4  ;;  %v714_v8 = vor.u32 %v982_v6, %v713_v5  ;;  %v788_v9 = vld [vmem:[%s1458_s1 + $0xd8] sm:$0xf]  ;;  %v996_v10 = vld [vmem:[%s1458_s1 + $0xe0] sm:$0xf0]  ;;  %v693_v11 = vld [vmem:[%s1458_s1 + $0x48] sm:$0xf] }
   0x4   :  { %129 = vmatpush.bf16.msra.mxu0 %v706_v3  ;;  %v789_v12 = vor.u32 %v996_v10, %v788_v9  ;;  %v978_v13 = vld [vmem:[%s1458_s1 + $0x50] sm:$0xf0]  ;;  %v977_v14 = vld [vmem:[%s1458_s1 + $0x4c] sm:$0xf]  ;;  %v695_v15 = vld [vmem:[%s1458_s1 + $0x54] sm:$0xf0] }
   0x5   :  { %143 = vmatpush.bf16.msra.mxu1 %v710_v7  ;;  %157 = vmatpush.bf16.msra.mxu2 %v714_v8  ;;  %v694_v16 = vor.u32 %v978_v13, %v693_v11  ;;  %v698_v17 = vor.u32 %v977_v14, %v695_v15  ;;  %v701_v18 = vld [vmem:[%s1458_s1 + $0x50] sm:$0xf]  ;;  %v979_v19 = vld [vmem:[%s1458_s1 + $0x58] sm:$0xf0]  ;;  %v776_v20 = vld [vmem:[%s1458_s1 + $0xc0] sm:$0xf] }
   0x6   :  { %272 = vmatpush.bf16.msra.mxu3 %v789_v12  ;;  %v702_v21 = vor.u32 %v979_v19, %v701_v18  ;;  %v993_v22 = vld [vmem:[%s1458_s1 + $0xc8] sm:$0xf0]  ;;  %v681_v23 = vld [vmem:[%s1458_s1 + $0x30] sm:$0xf]  ;;  %v975_v24 = vld [vmem:[%s1458_s1 + $0x38] sm:$0xf0] }
   0x7   :  { %v777_v25 = vor.u32 %v993_v22, %v776_v20  ;;  %v974_v26 = vld [vmem:[%s1458_s1 + $0x34] sm:$0xf]  ;;  %v683_v27 = vld [vmem:[%s1458_s1 + $0x3c] sm:$0xf0]  ;;  %v689_v28 = vld [vmem:[%s1458_s1 + $0x38] sm:$0xf]  ;;  %v682_v29 = vor.u32 %v975_v24, %v681_v23 }
   0x8   :  { %130 = vmatpush.bf16.msra.mxu0 %v694_v16  ;;  %v976_v30 = vld [vmem:[%s1458_s1 + $0x40] sm:$0xf0]  ;;  %v764_v31 = vld [vmem:[%s1458_s1 + $0xa8] sm:$0xf]  ;;  %v990_v32 = vld [vmem:[%s1458_s1 + $0xb0] sm:$0xf0]  ;;  %v686_v33 = vor.u32 %v974_v26, %v683_v27 }
   0x9   :  { %144 = vmatpush.bf16.msra.mxu1 %v698_v17  ;;  %158 = vmatpush.bf16.msra.mxu2 %v702_v21  ;;  %v690_v34 = vor.u32 %v976_v30, %v689_v28  ;;  %v669_v35 = vld [vmem:[%s1458_s1 + $0x18] sm:$0xf]  ;;  %v972_v36 = vld [vmem:[%s1458_s1 + $0x20] sm:$0xf0]  ;;  %v971_v37 = vld [vmem:[%s1458_s1 + $0x1c] sm:$0xf]  ;;  %v765_v38 = vor.u32 %v990_v32, %v764_v31 }
   0xa   :  { %273 = vmatpush.bf16.msra.mxu3 %v777_v25  ;;  %v671_v39 = vld [vmem:[%s1458_s1 + $0x24] sm:$0xf0]  ;;  %v677_v40 = vld [vmem:[%s1458_s1 + $0x20] sm:$0xf]  ;;  %v973_v41 = vld [vmem:[%s1458_s1 + $0x28] sm:$0xf0]  ;;  %v670_v44 = vor.u32 %v972_v36, %v669_v35 }
   0xb   :  { %v752_v42 = vld [vmem:[%s1458_s1 + $0x90] sm:$0xf]  ;;  %v987_v43 = vld [vmem:[%s1458_s1 + $0x98] sm:$0xf0]  ;;  %v657_v45 = vld [vmem:[%s1458_s1] sm:$0xf]  ;;  %v674_v47 = vor.u32 %v971_v37, %v671_v39  ;;  %v678_v48 = vor.u32 %v973_v41, %v677_v40 }
   0xc   :  { %131 = vmatpush.bf16.msra.mxu0 %v682_v29  ;;  %v969_v46 = vld [vmem:[%s1458_s1 + $0x8] sm:$0xf0]  ;;  %v968_v49 = vld [vmem:[%s1458_s1 + $0x4] sm:$0xf]  ;;  %v659_v50 = vld [vmem:[%s1458_s1 + $0xc] sm:$0xf0]  ;;  %v753_v52 = vor.u32 %v987_v43, %v752_v42 }
   0xd   :  { %145 = vmatpush.bf16.msra.mxu1 %v686_v33  ;;  %159 = vmatpush.bf16.msra.mxu2 %v690_v34  ;;  %v665_v51 = vld [vmem:[%s1458_s1 + $0x8] sm:$0xf]  ;;  %v970_v53 = vld [vmem:[%s1458_s1 + $0x10] sm:$0xf0]  ;;  %v740_v54 = vld [vmem:[%s1458_s1 + $0x78] sm:$0xf]  ;;  %v658_v59 = vor.u32 %v969_v46, %v657_v45  ;;  %v662_v63 = vor.u32 %v968_v49, %v659_v50 }
   0xe   :  { %274 = vmatpush.bf16.msra.mxu3 %v765_v38  ;;  %v984_v55 = vld [vmem:[%s1458_s1 + $0x80] sm:$0xf0]  ;;  %v995_v56 = vld [vmem:[%s1458_s1 + $0xdc] sm:$0xf]  ;;  %v790_v57 = vld [vmem:[%s1458_s1 + $0xe4] sm:$0xf0]  ;;  %v666_v0 = vor.u32 %v970_v53, %v665_v51 }
   0xf   :  { %v796_v58 = vld [vmem:[%s1458_s1 + $0xe0] sm:$0xf]  ;;  %v997_v60 = vld [vmem:[%s1458_s1 + $0xe8] sm:$0xf0]  ;;  %v871_v61 = vld [vmem:[%s1458_s1 + $0x150] sm:$0xf]  ;;  %v741_v3 = vor.u32 %v984_v55, %v740_v54  ;;  %v793_v4 = vor.u32 %v995_v56, %v790_v57 }
  0x10   :  { %132 = vmatpush.bf16.msra.mxu0 %v670_v44  ;;  %v1011_v62 = vld [vmem:[%s1458_s1 + $0x158] sm:$0xf0]  ;;  %v1010_v1 = vld [vmem:[%s1458_s1 + $0x154] sm:$0xf]  ;;  %v873_v2 = vld [vmem:[%s1458_s1 + $0x15c] sm:$0xf0]  ;;  %v797_v6 = vor.u32 %v997_v60, %v796_v58 }
  0x11   :  { %146 = vmatpush.bf16.msra.mxu1 %v674_v47  ;;  %160 = vmatpush.bf16.msra.mxu2 %v678_v48  ;;  %v1198_v5 = vld [vmem:[%s1459_s0] sm:$0xff]  ;;  %v872_v7 = vor.u32 %v1011_v62, %v871_v61  ;;  %v778_v9 = vld [vmem:[%s1458_s1 + $0xcc] sm:$0xf0]  ;;  %v784_v10 = vld [vmem:[%s1458_s1 + $0xc8] sm:$0xf]  ;;  %v876_v11 = vor.u32 %v1010_v1, %v873_v2 }
  0x12   :  { %275 = vmatpush.bf16.msra.mxu3 %v753_v52  ;;  %v992_v8 = vld [vmem:[%s1458_s1 + $0xc4] sm:$0xf]  ;;  %v994_v12 = vld [vmem:[%s1458_s1 + $0xd0] sm:$0xf0]  ;;  %v859_v13 = vld [vmem:[%s1458_s1 + $0x138] sm:$0xf] }
  0x13   :  { %v1008_v14 = vld [vmem:[%s1458_s1 + $0x140] sm:$0xf0]  ;;  %v1007_v15 = vld [vmem:[%s1458_s1 + $0x13c] sm:$0xf]  ;;  %v861_v16 = vld [vmem:[%s1458_s1 + $0x144] sm:$0xf0]  ;;  %v781_v17 = vor.u32 %v992_v8, %v778_v9  ;;  %v785_v18 = vor.u32 %v994_v12, %v784_v10 }
  0x14   :  { %133 = vmatpush.bf16.msra.mxu0 %v658_v59  ;;  %v860_v19 = vor.u32 %v1008_v14, %v859_v13  ;;  %v989_v20 = vld [vmem:[%s1458_s1 + $0xac] sm:$0xf]  ;;  %v766_v21 = vld [vmem:[%s1458_s1 + $0xb4] sm:$0xf0]  ;;  %v772_v22 = vld [vmem:[%s1458_s1 + $0xb0] sm:$0xf]  ;;  %v864_v23 = vor.u32 %v1007_v15, %v861_v16 }
  0x15   :  { %147 = vmatpush.bf16.msra.mxu1 %v662_v63  ;;  %161 = vmatpush.bf16.msra.mxu2 %v666_v0  ;;  %v991_v24 = vld [vmem:[%s1458_s1 + $0xb8] sm:$0xf0]  ;;  %v847_v25 = vld [vmem:[%s1458_s1 + $0x120] sm:$0xf]  ;;  %v1005_v26 = vld [vmem:[%s1458_s1 + $0x128] sm:$0xf0]  ;;  %v769_v29 = vor.u32 %v989_v20, %v766_v21 }
  0x16   :  { %276 = vmatpush.bf16.msra.mxu3 %v741_v3  ;;  %v1004_v27 = vld [vmem:[%s1458_s1 + $0x124] sm:$0xf]  ;;  %v849_v28 = vld [vmem:[%s1458_s1 + $0x12c] sm:$0xf0]  ;;  %v773_v30 = vor.u32 %v991_v24, %v772_v22  ;;  %v848_v31 = vor.u32 %v1005_v26, %v847_v25  ;;  %v986_v32 = vld [vmem:[%s1458_s1 + $0x94] sm:$0xf] }
  0x17   :  { %715 = vmatmul.msk.bf16.vlgmr.msra.gmra.mxu0 %vm122_vm0, %v1198_v5  ;;  %v754_v33 = vld [vmem:[%s1458_s1 + $0x9c] sm:$0xf0]  ;;  %v760_v34 = vld [vmem:[%s1458_s1 + $0x98] sm:$0xf]  ;;  %v852_v35 = vor.u32 %v1004_v27, %v849_v28  ;;  %v988_v36 = vld [vmem:[%s1458_s1 + $0xa0] sm:$0xf0] }
  0x18   :  { %286 = vmatpush.bf16.msrb.mxu0 %v793_v4  ;;  %716 = vmatmul.msk.bf16.vlgmr.msra.gmra.mxu1 %vm122_vm0, %v1198_v5  ;;  %v835_v37 = vld [vmem:[%s1458_s1 + $0x108] sm:$0xf]  ;;  %v1002_v38 = vld [vmem:[%s1458_s1 + $0x110] sm:$0xf0]  ;;  %v1001_v39 = vld [vmem:[%s1458_s1 + $0x10c] sm:$0xf]  ;;  %v757_v41 = vor.u32 %v986_v32, %v754_v33  ;;  %v761_v44 = vor.u32 %v988_v36, %v760_v34 }
  0x19   :  { %300 = vmatpush.bf16.msrb.mxu1 %v797_v6  ;;  %415 = vmatpush.bf16.msrb.mxu2 %v872_v7  ;;  %v837_v40 = vld [vmem:[%s1458_s1 + $0x114] sm:$0xf0]  ;;  %v983_v42 = vld [vmem:[%s1458_s1 + $0x7c] sm:$0xf]  ;;  %v742_v43 = vld [vmem:[%s1458_s1 + $0x84] sm:$0xf0]  ;;  %v836_v45 = vor.u32 %v1002_v38, %v835_v37 }
  0x1a   :  { %429 = vmatpush.bf16.msrb.mxu3 %v876_v11  ;;  %717 = vmatmul.msk.bf16.vlgmr.msra.gmra.mxu2 %vm122_vm0, %v1198_v5  ;;  %v748_v46 = vld [vmem:[%s1458_s1 + $0x80] sm:$0xf]  ;;  %v985_v47 = vld [vmem:[%s1458_s1 + $0x88] sm:$0xf0]  ;;  %v823_v48 = vld [vmem:[%s1458_s1 + $0xf0] sm:$0xf]  ;;  %v840_v49 = vor.u32 %v1001_v39, %v837_v40  ;;  %v745_v56 = vor.u32 %v983_v42, %v742_v43 }
  0x1b   :  { %798 = vmatmul.msk.bf16.vlgmr.msra.gmra.mxu3 %vm122_vm0, %v1198_v5  ;;  %v999_v50 = vld [vmem:[%s1458_s1 + $0xf8] sm:$0xf0]  ;;  %v998_v51 = vld [vmem:[%s1458_s1 + $0xf4] sm:$0xf]  ;;  %v825_v52 = vld [vmem:[%s1458_s1 + $0xfc] sm:$0xf0]  ;;  %v749_v60 = vor.u32 %v985_v47, %v748_v46 }
  0x1c   :  { %287 = vmatpush.bf16.msrb.mxu0 %v781_v17  ;;  %v879_v53 = vld [vmem:[%s1458_s1 + $0x158] sm:$0xf]  ;;  %v1012_v54 = vld [vmem:[%s1458_s1 + $0x160] sm:$0xf0]  ;;  %v954_v55 = vld [vmem:[%s1458_s1 + $0x1c8] sm:$0xf]  ;;  %v824_v61 = vor.u32 %v999_v50, %v823_v48  ;;  %v828_v0 = vor.u32 %v998_v51, %v825_v52 }
  0x1d   :  { %301 = vmatpush.bf16.msrb.mxu1 %v785_v18  ;;  %416 = vmatpush.bf16.msrb.mxu2 %v860_v19  ;;  %v1026_v57 = vld [vmem:[%s1458_s1 + $0x1d0] sm:$0xf0]  ;;  %v1025_v58 = vld [vmem:[%s1458_s1 + $0x1cc] sm:$0xf]  ;;  %v956_v59 = vld [vmem:[%s1458_s1 + $0x1d4] sm:$0xf0]  ;;  %v880_v1 = vor.u32 %v1012_v54, %v879_v53 }
  0x1e   :  { %430 = vmatpush.bf16.msrb.mxu3 %v864_v23  ;;  %v962_v62 = vld [vmem:[%s1458_s1 + $0x1d0] sm:$0xf]  ;;  %v1027_v63 = vld [vmem:[%s1458_s1 + $0x1d8] sm:$0xf0]  ;;  %v955_v2 = vor.u32 %v1026_v57, %v954_v55  ;;  %v959_v3 = vor.u32 %v1025_v58, %v956_v59  ;;  %v867_v4 = vld [vmem:[%s1458_s1 + $0x140] sm:$0xf] }
  0x1f   :  { %v1009_v6 = vld [vmem:[%s1458_s1 + $0x148] sm:$0xf0]  ;;  %v942_v7 = vld [vmem:[%s1458_s1 + $0x1b0] sm:$0xf]  ;;  %v963_v8 = vor.u32 %v1027_v63, %v962_v62  ;;  %v1023_v9 = vld [vmem:[%s1458_s1 + $0x1b8] sm:$0xf0] }
  0x20   :  { %288 = vmatpush.bf16.msrb.mxu0 %v769_v29  ;;  %v1022_v10 = vld [vmem:[%s1458_s1 + $0x1b4] sm:$0xf]  ;;  %v944_v11 = vld [vmem:[%s1458_s1 + $0x1bc] sm:$0xf0]  ;;  %v950_v12 = vld [vmem:[%s1458_s1 + $0x1b8] sm:$0xf]  ;;  %v868_v14 = vor.u32 %v1009_v6, %v867_v4  ;;  %v943_v15 = vor.u32 %v1023_v9, %v942_v7 }
  0x21   :  { %302 = vmatpush.bf16.msrb.mxu1 %v773_v30  ;;  %417 = vmatpush.bf16.msrb.mxu2 %v848_v31  ;;  %v1024_v13 = vld [vmem:[%s1458_s1 + $0x1c0] sm:$0xf0]  ;;  %v947_v16 = vor.u32 %v1022_v10, %v944_v11  ;;  %v855_v17 = vld [vmem:[%s1458_s1 + $0x128] sm:$0xf]  ;;  %v1006_v18 = vld [vmem:[%s1458_s1 + $0x130] sm:$0xf0] }
  0x22   :  { %431 = vmatpush.bf16.msrb.mxu3 %v852_v35  ;;  %v930_v19 = vld [vmem:[%s1458_s1 + $0x198] sm:$0xf]  ;;  %v951_v20 = vor.u32 %v1024_v13, %v950_v12  ;;  %v1020_v21 = vld [vmem:[%s1458_s1 + $0x1a0] sm:$0xf0]  ;;  %v1019_v22 = vld [vmem:[%s1458_s1 + $0x19c] sm:$0xf]  ;;  %v856_v26 = vor.u32 %v1006_v18, %v855_v17 }
  0x23   :  { %v932_v23 = vld [vmem:[%s1458_s1 + $0x1a4] sm:$0xf0]  ;;  %v938_v24 = vld [vmem:[%s1458_s1 + $0x1a0] sm:$0xf]  ;;  %v1021_v25 = vld [vmem:[%s1458_s1 + $0x1a8] sm:$0xf0]  ;;  %v931_v28 = vor.u32 %v1020_v21, %v930_v19 }
  0x24   :  { %289 = vmatpush.bf16.msrb.mxu0 %v757_v41  ;;  %v615_v27 = vld [vmem:[%s1460_s2] sm:$0xff]  ;;  %v935_v29 = vor.u32 %v1019_v22, %v932_v23  ;;  %v843_v30 = vld [vmem:[%s1458_s1 + $0x110] sm:$0xf]  ;;  %v1003_v31 = vld [vmem:[%s1458_s1 + $0x118] sm:$0xf0]  ;;  %v939_v33 = vor.u32 %v1021_v25, %v938_v24  ;;  %v1030_v37 = vmov 0  }
  0x25   :  { %303 = vmatpush.bf16.msrb.mxu1 %v761_v44  ;;  %418 = vmatpush.bf16.msrb.mxu2 %v836_v45  ;;  %v918_v32 = vld [vmem:[%s1458_s1 + $0x180] sm:$0xf]  ;;  %v1017_v34 = vld [vmem:[%s1458_s1 + $0x188] sm:$0xf0]  ;;  %v1016_v35 = vld [vmem:[%s1458_s1 + $0x184] sm:$0xf]  ;;  %v844_v40 = vor.u32 %v1003_v31, %v843_v30 }
  0x26   :  { %432 = vmatpush.bf16.msrb.mxu3 %v840_v49  ;;  %v920_v36 = vld [vmem:[%s1458_s1 + $0x18c] sm:$0xf0]  ;;  %1029 = vset.pattern.permute.xlu0 %v1030_v37  ;;  %v926_v38 = vld [vmem:[%s1458_s1 + $0x188] sm:$0xf]  ;;  %v1018_v39 = vld [vmem:[%s1458_s1 + $0x190] sm:$0xf0]  ;;  %v919_v41 = vor.u32 %v1017_v34, %v918_v32 }
  0x27   :  { %619 = vperm.xlu0 %1029, %v615_v27   ;;  %v923_v42 = vor.u32 %v1016_v35, %v920_v36  ;;  %v831_v43 = vld [vmem:[%s1458_s1 + $0xf8] sm:$0xf]  ;;  %v1000_v44 = vld [vmem:[%s1458_s1 + $0x100] sm:$0xf0]  ;;  %v906_v45 = vld [vmem:[%s1458_s1 + $0x168] sm:$0xf]  ;;  %v927_v46 = vor.u32 %v1018_v39, %v926_v38 }
  0x28   :  { %290 = vmatpush.bf16.msrb.mxu0 %v745_v56  ;;  %v1014_v47 = vld [vmem:[%s1458_s1 + $0x170] sm:$0xf0]  ;;  %v1013_v48 = vld [vmem:[%s1458_s1 + $0x16c] sm:$0xf]  ;;  %v908_v49 = vld [vmem:[%s1458_s1 + $0x174] sm:$0xf0]  ;;  %v832_v52 = vor.u32 %v1000_v44, %v831_v43 }
  0x29   :  { %304 = vmatpush.bf16.msrb.mxu1 %v749_v60  ;;  %419 = vmatpush.bf16.msrb.mxu2 %v824_v61  ;;  %v914_v50 = vld [vmem:[%s1458_s1 + $0x170] sm:$0xf]  ;;  %v1015_v51 = vld [vmem:[%s1458_s1 + $0x178] sm:$0xf0]  ;;  %v616_v53 = vld [vmem:[%s1460_s2 + $0x8] sm:$0xff]  ;;  %v907_v54 = vor.u32 %v1014_v47, %v906_v45  ;;  %v911_v55 = vor.u32 %v1013_v48, %v908_v49 }
  0x2a   :  { %433 = vmatpush.bf16.msrb.mxu3 %v828_v0  ;;  %v915_v56 = vor.u32 %v1015_v51, %v914_v50 }
  0x2b   :  { %799 = vmatmul.msk.bf16.vlgmr.msrb.gmra.mxu0 %vm122_vm0, %v1198_v5 }
  0x2c   :  { %443 = vmatpush.bf16.msra.mxu0 %v880_v1  ;;  %800 = vmatmul.msk.bf16.vlgmr.msrb.gmra.mxu1 %vm122_vm0, %v1198_v5 }
  0x2d   :  { %558 = vmatpush.bf16.msra.mxu1 %v955_v2  ;;  %572 = vmatpush.bf16.msra.mxu2 %v959_v3 }
  0x2e   :  { %586 = vmatpush.bf16.msra.mxu3 %v963_v8  ;;  %881 = vmatmul.msk.bf16.vlgmr.msrb.gmra.mxu2 %vm122_vm0, %v1198_v5 }
  0x2f   :  { %882 = vmatmul.msk.bf16.vlgmr.msrb.gmra.mxu3 %vm122_vm0, %v1198_v5  ;;  %624 = vperm.xlu0 %1029, %v616_v53  }
  0x30   :  { %444 = vmatpush.bf16.msra.mxu0 %v868_v14 }
  0x31   :  { %559 = vmatpush.bf16.msra.mxu1 %v943_v15  ;;  %573 = vmatpush.bf16.msra.mxu2 %v947_v16 }
  0x32   :  { %587 = vmatpush.bf16.msra.mxu3 %v951_v20 }
  0x34   :  { %445 = vmatpush.bf16.msra.mxu0 %v856_v26 }
  0x35   :  { %560 = vmatpush.bf16.msra.mxu1 %v931_v28  ;;  %574 = vmatpush.bf16.msra.mxu2 %v935_v29 }
  0x36   :  { %588 = vmatpush.bf16.msra.mxu3 %v939_v33 }
  0x38   :  { %446 = vmatpush.bf16.msra.mxu0 %v844_v40 }
  0x39   :  { %561 = vmatpush.bf16.msra.mxu1 %v919_v41  ;;  %575 = vmatpush.bf16.msra.mxu2 %v923_v42 }
  0x3a   :  { %589 = vmatpush.bf16.msra.mxu3 %v927_v46 }
  0x3c   :  { %447 = vmatpush.bf16.msra.mxu0 %v832_v52 }
  0x3d   :  { %562 = vmatpush.bf16.msra.mxu1 %v907_v54  ;;  %576 = vmatpush.bf16.msra.mxu2 %v911_v55 }
  0x3e   :  { %590 = vmatpush.bf16.msra.mxu3 %v915_v56 }
  0x3f   :  { %883 = vmatmul.msk.bf16.vlgmr.msra.gmra.mxu0 %vm122_vm0, %v1198_v5 }
  0x40   :  { %964 = vmatmul.msk.bf16.vlgmr.msra.gmra.mxu1 %vm122_vm0, %v1198_v5  ;;  %965 = vmatmul.msk.bf16.vlgmr.msra.gmra.mxu2 %vm122_vm0, %v1198_v5 }
  0x41   :  { %966 = vmatmul.msk.bf16.vlgmr.msra.gmra.mxu3 %vm122_vm0, %v1198_v5 }
  0x94   :  { %v135_v57 = vpop.f32.mrf.mxu0 }
  0x95   :  { %v149_v58 = vpop.f32.mrf.mxu1 }
  0x99   :  { %v620_v14 = vpop.permute.xlu0 %619 }
  0x9c   :  { %v137_v62 = vpop.f32.mrf.mxu0 }
  0x9d   :  { %v163_v59 = vpop.f32.mrf.mxu2  ;;  %v151_v61 = vpop.f32.mrf.mxu1 }
  0x9e   :  { %v278_v60 = vpop.f32.mrf.mxu3 }
  0x9f   :  { %v597_v12 = vmax.f32 %v135_v57, %v278_v60 }
  0xa1   :  { %v625_v41 = vpop.permute.xlu0 %624 }
  0xa5   :  { %v165_v63 = vpop.f32.mrf.mxu2 }
  0xa6   :  { %v280_v0 = vpop.f32.mrf.mxu3 }
  0xa7   :  { %v600_v26 = vmax.f32 %v137_v62, %v280_v0 }
  0xa8   :  { %v292_v2 = vpop.f32.mrf.mxu0 }
  0xa9   :  { %v306_v1 = vpop.f32.mrf.mxu1  ;;  %v598_v16 = vmax.f32 %v149_v58, %v292_v2 }
  0xaa   :  { %v599_v19 = vmax.f32 %v163_v59, %v306_v1 }
  0xb0   :  { %v294_v7 = vpop.f32.mrf.mxu0 }
  0xb1   :  { %v421_v3 = vpop.f32.mrf.mxu2  ;;  %v308_v6 = vpop.f32.mrf.mxu1  ;;  %v601_v34 = vmax.f32 %v151_v61, %v294_v7 }
  0xb2   :  { %v435_v4 = vpop.f32.mrf.mxu3  ;;  %v602_v39 = vmax.f32 %v165_v63, %v308_v6 }
  0xb9   :  { %v423_v8 = vpop.f32.mrf.mxu2 }
  0xba   :  { %v437_v9 = vpop.f32.mrf.mxu3 }
  0xbc   :  { %v449_v5 = vpop.f32.mrf.mxu0 }
  0xbd   :  { %v564_v10 = vpop.f32.mrf.mxu1 }
  0xbe   :  { %v603_v11 = vmax.f32 %v421_v3, %v564_v10 }
  0xc0   :  { %v609_v13 = vmax.f32 %v597_v12, %v603_v11 }
  0xc2   :  { %v627_v22 = vadd.f32 %v620_v14, %v609_v13 }
  0xc3   :  { %v578_v15 = vpop.f32.mrf.mxu2 }
  0xc4   :  { %v604_v17 = vmax.f32 %v435_v4, %v578_v15  ;;  %v592_v18 = vpop.f32.mrf.mxu3  ;;  %v633_v29 = vmax.f32 %v627_v22, 0.0  ;;  %v451_v36 = vpop.f32.mrf.mxu0 }
  0xc5   :  { %v605_v20 = vmax.f32 %v449_v5, %v592_v18  ;;  %v566_v21 = vpop.f32.mrf.mxu1 }
  0xc6   :  { %v610_v23 = vmax.f32 %v598_v16, %v604_v17  ;;  %v606_v24 = vmax.f32 %v423_v8, %v566_v21 }
  0xc7   :  { %v611_v25 = vmax.f32 %v599_v19, %v605_v20 }
  0xc8   :  { %v628_v27 = vadd.f32 %v620_v14, %v610_v23  ;;  %v612_v31 = vmax.f32 %v600_v26, %v606_v24 }
  0xc9   :  { %v629_v28 = vadd.f32 %v620_v14, %v611_v25 }
  0xca   :  { %v634_v30 = vmax.f32 %v628_v27, 0.0  ;;  %v630_v43 = vadd.f32 %v625_v41, %v612_v31 }
  0xcb   :  { %v635_v32 = vmax.f32 %v629_v28, 0.0  ;;  %v580_v33 = vpop.f32.mrf.mxu2 }
  0xcc   :  { %v639_v35 = vpack.c.bf16 %v634_v30, %v633_v29  ;;  %v607_v37 = vmax.f32 %v437_v9, %v580_v33  ;;  %v594_v38 = vpop.f32.mrf.mxu3  ;;  %v636_v48 = vmax.f32 %v630_v43, 0.0 }
  0xcd   :  { %v640_v40 = vpack.c.bf16 %v635_v32, %v635_v32  ;;  %v608_v42 = vmax.f32 %v451_v36, %v594_v38 }
  0xce   :  { %643 = vst [vmem:[%s1461_s3] sm:$0xff] %v639_v35  ;;  %v613_v44 = vmax.f32 %v601_v34, %v607_v37 }
  0xcf   :  { %644 = vst [vmem:[%s1461_s3 + $0x8] sm:$0xf] %v640_v40  ;;  %v614_v45 = vmax.f32 %v602_v39, %v608_v42 }
  0xd0   :  { %v631_v46 = vadd.f32 %v625_v41, %v613_v44 }
  0xd1   :  { %v632_v47 = vadd.f32 %v625_v41, %v614_v45 }
  0xd2   :  { %v637_v49 = vmax.f32 %v631_v46, 0.0 }
  0xd3   :  { %v638_v50 = vmax.f32 %v632_v47, 0.0 }
  0xd4   :  { %v641_v51 = vpack.c.bf16 %v637_v49, %v636_v48 }
  0xd5   :  { %v642_v52 = vpack.c.bf16 %v638_v50, %v638_v50 }
  0xd6   :  { %645 = vst [vmem:[%s1461_s3 + $0xc] sm:$0xff] %v641_v51 }
  0xd7   :  { %646 = vst [vmem:[%s1461_s3 + $0x14] sm:$0xf] %v642_v52 }

// kernel: net2_forward.7
= control target key start
LH: loop header
LB: loop body
LE: loop exit
PB: predicated region body
PF: predicated region fallthrough
CT: control target
= control target key end

     0   :  { %vm146_vm0 = vcmask 130048   ;;  %v322_v39 = vmov 0   ;;  %s477_s1 = inlined_call_operand.vmem [shape: bf16[144,256], index: 1, kind: input, shape index: {}]   ;;  %s478_s0 = inlined_call_operand.vmem [shape: bf16[16,144], index: 0, kind: input, shape index: {}]   ;;  %s479_s2 = inlined_call_operand.vmem [shape: f32[16,1], index: 2, kind: input, shape index: {}]   ;;  %s480_s3 = inlined_call_operand.vmem [shape: bf16[16,256], index: 3, kind: output, shape index: {}]  }
   0x1   :  { %v284_v0 = vld [vmem:[%s477_s1 + $0x70] sm:$0xf]  ;;  %v317_v1 = vld [vmem:[%s477_s1 + $0x74] sm:$0xf0]  ;;  %v316_v2 = vld [vmem:[%s477_s1 + $0x74] sm:$0xf]  ;;  %321 = vset.pattern.permute.xlu0 %v322_v39 }
   0x2   :  { %v285_v3 = vor.u32 %v317_v1, %v284_v0  ;;  %v286_v4 = vld [vmem:[%s477_s1 + $0x78] sm:$0xf0]  ;;  %v276_v5 = vld [vmem:[%s477_s1 + $0x60] sm:$0xf]  ;;  %v315_v6 = vld [vmem:[%s477_s1 + $0x64] sm:$0xf0] }
   0x3   :  { %v289_v7 = vor.u32 %v316_v2, %v286_v4  ;;  %v314_v8 = vld [vmem:[%s477_s1 + $0x64] sm:$0xf]  ;;  %v278_v9 = vld [vmem:[%s477_s1 + $0x68] sm:$0xf0]  ;;  %v277_v10 = vor.u32 %v315_v6, %v276_v5  ;;  %v268_v12 = vld [vmem:[%s477_s1 + $0x50] sm:$0xf] }
   0x4   :  { %150 = vmatpush.bf16.msra.mxu0 %v285_v3  ;;  %v281_v11 = vor.u32 %v314_v8, %v278_v9  ;;  %v313_v13 = vld [vmem:[%s477_s1 + $0x54] sm:$0xf0]  ;;  %v312_v14 = vld [vmem:[%s477_s1 + $0x54] sm:$0xf]  ;;  %v270_v15 = vld [vmem:[%s477_s1 + $0x58] sm:$0xf0] }
   0x5   :  { %178 = vmatpush.bf16.msra.mxu2 %v289_v7  ;;  %v269_v16 = vor.u32 %v313_v13, %v268_v12  ;;  %v260_v17 = vld [vmem:[%s477_s1 + $0x40] sm:$0xf]  ;;  %v273_v18 = vor.u32 %v312_v14, %v270_v15  ;;  %v311_v19 = vld [vmem:[%s477_s1 + $0x44] sm:$0xf0]  ;;  %v318_v20 = vld [vmem:[%s477_s1 + $0x84] sm:$0xf] }
   0x6   :  { %v294_v21 = vld [vmem:[%s477_s1 + $0x88] sm:$0xf0]  ;;  %v310_v22 = vld [vmem:[%s477_s1 + $0x44] sm:$0xf]  ;;  %v261_v27 = vor.u32 %v311_v19, %v260_v17  ;;  %v292_v29 = vld [vmem:[%s477_s1 + $0x80] sm:$0xf] }
   0x7   :  { %v262_v23 = vld [vmem:[%s477_s1 + $0x48] sm:$0xf0]  ;;  %v297_v24 = vor.u32 %v318_v20, %v294_v21  ;;  %v300_v25 = vld [vmem:[%s478_s0 + $0x4] sm:$0xf]  ;;  %v319_v30 = vld [vmem:[%s477_s1 + $0x84] sm:$0xf0] }
   0x8   :  { %151 = vmatpush.bf16.msra.mxu0 %v277_v10  ;;  %v222_v26 = vld [vmem:[%s478_s0 + $0x8] sm:$0xf0]  ;;  %v265_v31 = vor.u32 %v310_v22, %v262_v23  ;;  %v252_v32 = vld [vmem:[%s477_s1 + $0x30] sm:$0xf]  ;;  %v309_v33 = vld [vmem:[%s477_s1 + $0x34] sm:$0xf0]  ;;  %v293_v34 = vor.u32 %v319_v30, %v292_v29 }
   0x9   :  { %179 = vmatpush.bf16.msra.mxu2 %v281_v11  ;;  %199 = vmatpush.bf16.msra.mxu3 %v297_v24  ;;  %v225_v28 = vor.u32 %v300_v25, %v222_v26  ;;  %v308_v35 = vld [vmem:[%s477_s1 + $0x34] sm:$0xf]  ;;  %v254_v36 = vld [vmem:[%s477_s1 + $0x38] sm:$0xf0]  ;;  %v35_v37 = vld [vmem:[%s479_s2] sm:$0xff]  ;;  %v253_v38 = vor.u32 %v309_v33, %v252_v32 }
   0xa   :  { %171 = vmatpush.bf16.msra.mxu1 %v293_v34  ;;  %v257_v40 = vor.u32 %v308_v35, %v254_v36  ;;  %v244_v41 = vld [vmem:[%s477_s1 + $0x20] sm:$0xf]  ;;  %v307_v42 = vld [vmem:[%s477_s1 + $0x24] sm:$0xf0]  ;;  %39 = vperm.xlu0 %321, %v35_v37   ;;  %v306_v43 = vld [vmem:[%s477_s1 + $0x24] sm:$0xf] }
   0xb   :  { %v246_v44 = vld [vmem:[%s477_s1 + $0x28] sm:$0xf0]  ;;  %v245_v45 = vor.u32 %v307_v42, %v244_v41  ;;  %v236_v47 = vld [vmem:[%s477_s1 + $0x10] sm:$0xf]  ;;  %v305_v48 = vld [vmem:[%s477_s1 + $0x14] sm:$0xf0] }
   0xc   :  { %152 = vmatpush.bf16.msra.mxu0 %v269_v16  ;;  %299 = vmatmul.msk.bf16.vlgmr.msra.gmra.mxu3 %vm146_vm0, %v225_v28  ;;  %v249_v46 = vor.u32 %v306_v43, %v246_v44  ;;  %v304_v49 = vld [vmem:[%s477_s1 + $0x14] sm:$0xf]  ;;  %v238_v50 = vld [vmem:[%s477_s1 + $0x18] sm:$0xf0]  ;;  %v36_v51 = vld [vmem:[%s479_s2 + $0x8] sm:$0xff]  ;;  %v237_v52 = vor.u32 %v305_v48, %v236_v47 }
   0xd   :  { %180 = vmatpush.bf16.msra.mxu2 %v273_v18  ;;  %298 = vmatmul.msk.bf16.vlgmr.msra.gmra.mxu1 %vm146_vm0, %v225_v28  ;;  %v241_v53 = vor.u32 %v304_v49, %v238_v50  ;;  %v228_v54 = vld [vmem:[%s477_s1] sm:$0xf]  ;;  %v303_v55 = vld [vmem:[%s477_s1 + $0x4] sm:$0xf0]  ;;  %v302_v56 = vld [vmem:[%s477_s1 + $0x4] sm:$0xf] }
   0xe   :  { %v230_v57 = vld [vmem:[%s477_s1 + $0x8] sm:$0xf0]  ;;  %v229_v58 = vor.u32 %v303_v55, %v228_v54  ;;  %v220_v59 = vld [vmem:[%s478_s0] sm:$0xf]  ;;  %v301_v60 = vld [vmem:[%s478_s0 + $0x4] sm:$0xf0] }
   0xf   :  { %v233_v61 = vor.u32 %v302_v56, %v230_v57  ;;  %v221_v62 = vor.u32 %v301_v60, %v220_v59 }
  0x10   :  { %153 = vmatpush.bf16.msra.mxu0 %v261_v27 }
  0x11   :  { %181 = vmatpush.bf16.msra.mxu2 %v265_v31 }
  0x12   :  { %44 = vperm.xlu0 %321, %v36_v51  }
  0x14   :  { %154 = vmatpush.bf16.msra.mxu0 %v253_v38 }
  0x15   :  { %182 = vmatpush.bf16.msra.mxu2 %v257_v40 }
  0x18   :  { %155 = vmatpush.bf16.msra.mxu0 %v245_v45 }
  0x19   :  { %183 = vmatpush.bf16.msra.mxu2 %v249_v46 }
  0x1c   :  { %156 = vmatpush.bf16.msra.mxu0 %v237_v52 }
  0x1d   :  { %184 = vmatpush.bf16.msra.mxu2 %v241_v53 }
  0x20   :  { %157 = vmatpush.bf16.msra.mxu0 %v229_v58 }
  0x21   :  { %185 = vmatpush.bf16.msra.mxu2 %v233_v61 }
  0x23   :  { %158 = vmatmul.bf16.vlgmr.msra.gmra.mxu0 %v221_v62 }
  0x24   :  { %186 = vmatmul.bf16.vlgmr.msra.gmra.mxu2 %v221_v62 }
  0x7c   :  { %v40_v0 = vpop.permute.xlu0 %39 }
  0x84   :  { %v45_v10 = vpop.permute.xlu0 %44 }
  0x8a   :  { %v173_v2 = vpop.f32.mrf.mxu1 }
  0x8f   :  { %v201_v4 = vpop.f32.mrf.mxu3 }
  0x92   :  { %v175_v14 = vpop.f32.mrf.mxu1 }
  0x97   :  { %v203_v18 = vpop.f32.mrf.mxu3 }
  0xa0   :  { %v159_v63 = vpop.f32.mrf.mxu0 }
  0xa1   :  { %v160_v1 = vadd.f32 %v159_v63, %v40_v0 }
  0xa3   :  { %v174_v3 = vadd.f32 %v173_v2, %v160_v1 }
  0xa5   :  { %v206_v8 = vmax.f32 %v174_v3, 0.0 }
  0xa7   :  { %v187_v5 = vpop.f32.mrf.mxu2 }
  0xa8   :  { %v188_v6 = vadd.f32 %v187_v5, %v40_v0  ;;  %v161_v7 = vpop.f32.mrf.mxu0 }
  0xa9   :  { %v162_v12 = vadd.f32 %v161_v7, %v45_v10 }
  0xaa   :  { %v202_v9 = vadd.f32 %v201_v4, %v188_v6 }
  0xab   :  { %v176_v16 = vadd.f32 %v175_v14, %v162_v12 }
  0xac   :  { %v207_v11 = vmax.f32 %v202_v9, 0.0 }
  0xad   :  { %v208_v20 = vmax.f32 %v176_v16, 0.0 }
  0xae   :  { %v210_v13 = vpack.c.bf16 %v207_v11, %v206_v8 }
  0xaf   :  { %v189_v15 = vpop.f32.mrf.mxu2 }
  0xb0   :  { %212 = vst [vmem:[%s480_s3] sm:$0xff] %v210_v13  ;;  %v190_v17 = vadd.f32 %v189_v15, %v45_v10 }
  0xb2   :  { %v204_v19 = vadd.f32 %v203_v18, %v190_v17 }
  0xb4   :  { %v209_v21 = vmax.f32 %v204_v19, 0.0 }
  0xb6   :  { %v211_v22 = vpack.c.bf16 %v209_v21, %v208_v20 }
  0xb8   :  { %213 = vst [vmem:[%s480_s3 + $0x8] sm:$0xff] %v211_v22 }

// kernel: net2_forward.8
= control target key start
LH: loop header
LB: loop body
LE: loop exit
PB: predicated region body
PF: predicated region fallthrough
CT: control target
= control target key end

     0   :  { %v283_v6 = vmov 0   ;;  %vm133_vm0 = vcmask 130048   ;;  %s375_s1 = inlined_call_operand.vmem [shape: bf16[144,128], index: 1, kind: input, shape index: {}]   ;;  %s376_s0 = inlined_call_operand.vmem [shape: bf16[32,144], index: 0, kind: input, shape index: {}]   ;;  %s377_s2 = inlined_call_operand.vmem [shape: f32[32,1], index: 2, kind: input, shape index: {}]   ;;  %s378_s3 = inlined_call_operand.vmem [shape: bf16[32,128], index: 3, kind: output, shape index: {}]  }
   0x1   :  { %v259_v0 = vld [vmem:[%s375_s1 + $0x38] sm:$0xff]  ;;  %v260_v1 = vld [vmem:[%s375_s1 + $0x40] sm:$0xff]  ;;  %v258_v3 = vld [vmem:[%s375_s1 + $0x30] sm:$0xff]  ;;  %282 = vset.pattern.permute.xlu1 %v283_v6  ;;  %281 = vset.pattern.permute.xlu0 %v283_v6 }
   0x2   :  { %v248_v2 = vld [vmem:[%s376_s0 + $0x4] sm:$0xf]  ;;  %140 = vmatpush.bf16.msra.mxu0 %v259_v0  ;;  %272 = vmatpush.bf16.msra.mxu2 %v259_v0  ;;  %v198_v4 = vld [vmem:[%s376_s0 + $0x8] sm:$0xf0]  ;;  %v39_v7 = vld [vmem:[%s377_s2 + $0x10] sm:$0xff] }
   0x3   :  { %166 = vmatpush.bf16.msra.mxu1 %v260_v1  ;;  %v201_v5 = vor.u32 %v248_v2, %v198_v4  ;;  %v257_v8 = vld [vmem:[%s375_s1 + $0x28] sm:$0xff]  ;;  %v37_v9 = vld [vmem:[%s377_s2] sm:$0xff]  ;;  %53 = vperm.xlu1 %282, %v39_v7   ;;  %v40_v11 = vld [vmem:[%s377_s2 + $0x18] sm:$0xff] }
   0x4   :  { %43 = vperm.xlu0 %281, %v37_v9   ;;  %v256_v10 = vld [vmem:[%s375_s1 + $0x20] sm:$0xff]  ;;  %v38_v12 = vld [vmem:[%s377_s2 + $0x8] sm:$0xff]  ;;  %v255_v13 = vld [vmem:[%s375_s1 + $0x18] sm:$0xff] }
   0x5   :  { %v250_v14 = vld [vmem:[%s376_s0 + $0x14] sm:$0xf]  ;;  %v206_v15 = vld [vmem:[%s376_s0 + $0x18] sm:$0xf0]  ;;  %v253_v18 = vld [vmem:[%s375_s1 + $0x8] sm:$0xff] }
   0x6   :  { %141 = vmatpush.bf16.msra.mxu0 %v258_v3  ;;  %273 = vmatpush.bf16.msra.mxu2 %v258_v3  ;;  %v254_v16 = vld [vmem:[%s375_s1 + $0x10] sm:$0xff]  ;;  %v209_v17 = vor.u32 %v250_v14, %v206_v15  ;;  %v252_v19 = vld [vmem:[%s375_s1] sm:$0xff]  ;;  %v249_v21 = vld [vmem:[%s376_s0 + $0x4] sm:$0xf0] }
   0x7   :  { %246 = vmatmul.msk.bf16.vlgmr.msra.gmra.mxu1 %vm133_vm0, %v201_v5  ;;  %v196_v20 = vld [vmem:[%s376_s0] sm:$0xf]  ;;  %v204_v22 = vld [vmem:[%s376_s0 + $0x10] sm:$0xf]  ;;  %v251_v23 = vld [vmem:[%s376_s0 + $0x14] sm:$0xf0] }
   0x8   :  { %v197_v24 = vor.u32 %v249_v21, %v196_v20  ;;  %v205_v25 = vor.u32 %v251_v23, %v204_v22 }
   0xa   :  { %142 = vmatpush.bf16.msra.mxu0 %v257_v8  ;;  %274 = vmatpush.bf16.msra.mxu2 %v257_v8 }
   0xb   :  { %58 = vperm.xlu1 %282, %v40_v11  }
   0xc   :  { %48 = vperm.xlu0 %281, %v38_v12  }
   0xe   :  { %143 = vmatpush.bf16.msra.mxu0 %v256_v10  ;;  %275 = vmatpush.bf16.msra.mxu2 %v256_v10 }
  0x12   :  { %144 = vmatpush.bf16.msra.mxu0 %v255_v13  ;;  %276 = vmatpush.bf16.msra.mxu2 %v255_v13 }
  0x16   :  { %145 = vmatpush.bf16.msra.mxu0 %v254_v16  ;;  %277 = vmatpush.bf16.msra.mxu2 %v254_v16 }
  0x17   :  { %247 = vmatmul.msk.bf16.gmra.mxu1 %vm133_vm0, %v209_v17 }
  0x1a   :  { %146 = vmatpush.bf16.msra.mxu0 %v253_v18  ;;  %278 = vmatpush.bf16.msra.mxu2 %v253_v18 }
  0x1e   :  { %147 = vmatpush.bf16.msra.mxu0 %v252_v19  ;;  %279 = vmatpush.bf16.msra.mxu2 %v252_v19 }
  0x21   :  { %148 = vmatmul.bf16.vlgmr.msra.gmra.mxu0 %v197_v24  ;;  %153 = vmatmul.bf16.vlgmr.msra.gmra.mxu2 %v205_v25 }
  0x75   :  { %v54_v30 = vpop.permute.xlu1 %53 }
  0x76   :  { %v44_v28 = vpop.permute.xlu0 %43 }
  0x7d   :  { %v59_v42 = vpop.permute.xlu1 %58 }
  0x7e   :  { %v49_v34 = vpop.permute.xlu0 %48 }
  0x84   :  { %v168_v26 = vpop.f32.mrf.mxu1 }
  0x8c   :  { %v170_v27 = vpop.f32.mrf.mxu1 }
  0x94   :  { %v173_v32 = vpop.f32.mrf.mxu1 }
  0x9c   :  { %v175_v47 = vpop.f32.mrf.mxu1 }
  0x9e   :  { %v149_v29 = vpop.f32.mrf.mxu0 }
  0x9f   :  { %v150_v31 = vadd.f32 %v149_v29, %v44_v28 }
  0xa1   :  { %v169_v36 = vadd.f32 %v168_v26, %v150_v31 }
  0xa3   :  { %v178_v40 = vmax.f32 %v169_v36, 0.0 }
  0xa4   :  { %v154_v33 = vpop.f32.mrf.mxu2 }
  0xa5   :  { %v155_v38 = vadd.f32 %v154_v33, %v54_v30 }
  0xa6   :  { %v151_v35 = vpop.f32.mrf.mxu0 }
  0xa7   :  { %v152_v37 = vadd.f32 %v151_v35, %v49_v34  ;;  %v174_v44 = vadd.f32 %v173_v32, %v155_v38 }
  0xa9   :  { %v171_v39 = vadd.f32 %v170_v27, %v152_v37  ;;  %v180_v49 = vmax.f32 %v174_v44, 0.0 }
  0xab   :  { %v179_v41 = vmax.f32 %v171_v39, 0.0 }
  0xac   :  { %v156_v43 = vpop.f32.mrf.mxu2 }
  0xad   :  { %v264_v45 = vpack.c.bf16 %v179_v41, %v178_v40  ;;  %v157_v46 = vadd.f32 %v156_v43, %v59_v42 }
  0xaf   :  { %265 = vst [vmem:[%s378_s3] sm:$0xff] %v264_v45   ;;  %v176_v48 = vadd.f32 %v175_v47, %v157_v46 }
  0xb1   :  { %v181_v50 = vmax.f32 %v176_v48, 0.0 }
  0xb3   :  { %v269_v51 = vpack.c.bf16 %v181_v50, %v180_v49 }
  0xb5   :  { %271 = vst [vmem:[%s378_s3 + $0x8] sm:$0xff] %v269_v51  }

// kernel: net2_forward.9
= control target key start
LH: loop header
LB: loop body
LE: loop exit
PB: predicated region body
PF: predicated region fallthrough
CT: control target
= control target key end

     0   :  { %v2966_v3 = vmov 0   ;;  %vm1972_vm0 = vcmask 523264   ;;  %s3870_s0 = inlined_call_operand.vmem [shape: bf16[2048,128], index: 0, kind: input, shape index: {}]   ;;  %s3871_s2 = inlined_call_operand.vmem [shape: f32[64,1], index: 2, kind: input, shape index: {}]   ;;  %s3872_s1 = inlined_call_operand.vmem [shape: bf16[64,2048], index: 1, kind: input, shape index: {}]   ;;  %s3873_s4 = inlined_call_operand.vmem [shape: f32[10,1], index: 4, kind: input, shape index: {}]   ;;  %s3874_s3 = inlined_call_operand.vmem [shape: bf16[10,64], index: 3, kind: input, shape index: {}]   ;;  %s3875_s5 = inlined_call_operand.vmem [shape: f32[10,128], index: 5, kind: output, shape index: {}]  }
   0x1   :  { %v2840_v0 = vld [vmem:[%s3870_s0 + $0x38] sm:$0xff]  ;;  %2963 = vset.pattern.permute.xlu0 %v2966_v3  ;;  %2964 = vset.pattern.permute.xlu1 %v2966_v3  ;;  %v2839_v5 = vld [vmem:[%s3870_s0 + $0x30] sm:$0xff]  ;;  %v2838_v9 = vld [vmem:[%s3870_s0 + $0x28] sm:$0xff] }
   0x2   :  { %v2848_v1 = vld [vmem:[%s3870_s0 + $0x78] sm:$0xff]  ;;  %2965 = vset.pattern.permute.xlu2 %v2966_v3  ;;  %1477 = vmatpush.bf16.msra.mxu0 %v2840_v0  ;;  %v2847_v6 = vld [vmem:[%s3870_s0 + $0x70] sm:$0xff]  ;;  %v2846_v10 = vld [vmem:[%s3870_s0 + $0x68] sm:$0xff] }
   0x3   :  { %v2856_v2 = vld [vmem:[%s3870_s0 + $0xb8] sm:$0xff]  ;;  %1506 = vmatpush.bf16.msra.mxu1 %v2848_v1  ;;  %v2855_v7 = vld [vmem:[%s3870_s0 + $0xb0] sm:$0xff]  ;;  %v2854_v11 = vld [vmem:[%s3870_s0 + $0xa8] sm:$0xff] }
   0x4   :  { %v2864_v4 = vld [vmem:[%s3870_s0 + $0xf8] sm:$0xff]  ;;  %1535 = vmatpush.bf16.msra.mxu2 %v2856_v2  ;;  %v2863_v8 = vld [vmem:[%s3870_s0 + $0xf0] sm:$0xff]  ;;  %v2862_v12 = vld [vmem:[%s3870_s0 + $0xe8] sm:$0xff] }
   0x5   :  { %1564 = vmatpush.bf16.msra.mxu3 %v2864_v4  ;;  %v347_v13 = vld [vmem:[%s3871_s2 + $0x30] sm:$0xff]  ;;  %v2837_v14 = vld [vmem:[%s3870_s0 + $0x20] sm:$0xff]  ;;  %v2836_v19 = vld [vmem:[%s3870_s0 + $0x18] sm:$0xff] }
   0x6   :  { %1478 = vmatpush.bf16.msra.mxu0 %v2839_v5  ;;  %v2845_v15 = vld [vmem:[%s3870_s0 + $0x60] sm:$0xff]  ;;  %381 = vperm.xlu0 %2963, %v347_v13   ;;  %v2844_v20 = vld [vmem:[%s3870_s0 + $0x58] sm:$0xff]  ;;  %v2835_v24 = vld [vmem:[%s3870_s0 + $0x10] sm:$0xff] }
   0x7   :  { %1507 = vmatpush.bf16.msra.mxu1 %v2847_v6  ;;  %v2853_v16 = vld [vmem:[%s3870_s0 + $0xa0] sm:$0xff]  ;;  %v2852_v21 = vld [vmem:[%s3870_s0 + $0x98] sm:$0xff]  ;;  %v2843_v25 = vld [vmem:[%s3870_s0 + $0x50] sm:$0xff] }
   0x8   :  { %1536 = vmatpush.bf16.msra.mxu2 %v2855_v7  ;;  %v2861_v17 = vld [vmem:[%s3870_s0 + $0xe0] sm:$0xff]  ;;  %v2860_v22 = vld [vmem:[%s3870_s0 + $0xd8] sm:$0xff]  ;;  %v2851_v26 = vld [vmem:[%s3870_s0 + $0x90] sm:$0xff] }
   0x9   :  { %1565 = vmatpush.bf16.msra.mxu3 %v2863_v8  ;;  %v345_v18 = vld [vmem:[%s3871_s2 + $0x20] sm:$0xff]  ;;  %v348_v23 = vld [vmem:[%s3871_s2 + $0x38] sm:$0xff]  ;;  %v2859_v27 = vld [vmem:[%s3870_s0 + $0xd0] sm:$0xff] }
   0xa   :  { %1479 = vmatpush.bf16.msra.mxu0 %v2838_v9  ;;  %371 = vperm.xlu1 %2964, %v345_v18   ;;  %v346_v28 = vld [vmem:[%s3871_s2 + $0x28] sm:$0xff]  ;;  %v2833_v33 = vld [vmem:[%s3870_s0] sm:$0xff]  ;;  %v2872_v51 = vld [vmem:[%s3870_s0 + $0x138] sm:$0xff] }
   0xb   :  { %1508 = vmatpush.bf16.msra.mxu1 %v2846_v10  ;;  %v2834_v29 = vld [vmem:[%s3870_s0 + $0x8] sm:$0xff]  ;;  %v2841_v34 = vld [vmem:[%s3870_s0 + $0x40] sm:$0xff]  ;;  %v2880_v52 = vld [vmem:[%s3870_s0 + $0x178] sm:$0xff] }
   0xc   :  { %1537 = vmatpush.bf16.msra.mxu2 %v2854_v11  ;;  %v2842_v30 = vld [vmem:[%s3870_s0 + $0x48] sm:$0xff]  ;;  %v2849_v35 = vld [vmem:[%s3870_s0 + $0x80] sm:$0xff]  ;;  %v2888_v53 = vld [vmem:[%s3870_s0 + $0x1b8] sm:$0xff] }
   0xd   :  { %1566 = vmatpush.bf16.msra.mxu3 %v2862_v12  ;;  %v2850_v31 = vld [vmem:[%s3870_s0 + $0x88] sm:$0xff]  ;;  %v2857_v36 = vld [vmem:[%s3870_s0 + $0xc0] sm:$0xff]  ;;  %v2896_v54 = vld [vmem:[%s3870_s0 + $0x1f8] sm:$0xff] }
   0xe   :  { %1480 = vmatpush.bf16.msra.mxu0 %v2837_v14  ;;  %386 = vperm.xlu0 %2963, %v348_v23   ;;  %v2858_v32 = vld [vmem:[%s3870_s0 + $0xc8] sm:$0xff]  ;;  %v1998_v37 = vld [vmem:[%s3872_s1] sm:$0xf]  ;;  %v2769_v40 = vld [vmem:[%s3872_s1 + $0x4] sm:$0xf] }
   0xf   :  { %1509 = vmatpush.bf16.msra.mxu1 %v2845_v15  ;;  %v2777_v38 = vld [vmem:[%s3872_s1 + $0x3c] sm:$0xf0]  ;;  %v2000_v41 = vld [vmem:[%s3872_s1 + $0x40] sm:$0xf0]  ;;  %v2006_v42 = vld [vmem:[%s3872_s1 + $0x8] sm:$0xf] }
  0x10   :  { %1538 = vmatpush.bf16.msra.mxu2 %v2853_v16  ;;  %v341_v39 = vld [vmem:[%s3871_s2] sm:$0xff]  ;;  %v2778_v43 = vld [vmem:[%s3872_s1 + $0x44] sm:$0xf0]  ;;  %v2770_v44 = vld [vmem:[%s3872_s1 + $0xc] sm:$0xf]  ;;  %v1999_v46 = vor.u32 %v2777_v38, %v1998_v37  ;;  %v2003_v47 = vor.u32 %v2769_v40, %v2000_v41 }
  0x11   :  { %1567 = vmatpush.bf16.msra.mxu3 %v2861_v17  ;;  %v2008_v45 = vld [vmem:[%s3872_s1 + $0x48] sm:$0xf0]  ;;  %v2007_v49 = vor.u32 %v2778_v43, %v2006_v42  ;;  %v2871_v55 = vld [vmem:[%s3870_s0 + $0x130] sm:$0xff]  ;;  %v2062_v61 = vld [vmem:[%s3872_s1 + $0x80] sm:$0xf] }
  0x12   :  { %1481 = vmatpush.bf16.msra.mxu0 %v2836_v19  ;;  %376 = vperm.xlu1 %2964, %v346_v28   ;;  %v342_v48 = vld [vmem:[%s3871_s2 + $0x8] sm:$0xff]  ;;  %v2011_v50 = vor.u32 %v2770_v44, %v2008_v45  ;;  %v2879_v56 = vld [vmem:[%s3870_s0 + $0x170] sm:$0xff]  ;;  %v2793_v0 = vld [vmem:[%s3872_s1 + $0xbc] sm:$0xf0] }
  0x13   :  { %1510 = vmatpush.bf16.msra.mxu1 %v2844_v20  ;;  %v2887_v57 = vld [vmem:[%s3870_s0 + $0x1b0] sm:$0xff]  ;;  %v2870_v59 = vld [vmem:[%s3870_s0 + $0x128] sm:$0xff]  ;;  %v2785_v1 = vld [vmem:[%s3872_s1 + $0x84] sm:$0xf]  ;;  %v2063_v11 = vor.u32 %v2793_v0, %v2062_v61 }
  0x14   :  { %1539 = vmatpush.bf16.msra.mxu2 %v2852_v21  ;;  %v2895_v58 = vld [vmem:[%s3870_s0 + $0x1f0] sm:$0xff]  ;;  %v2878_v60 = vld [vmem:[%s3870_s0 + $0x168] sm:$0xff]  ;;  %v2064_v2 = vld [vmem:[%s3872_s1 + $0xc0] sm:$0xf0] }
  0x15   :  { %1568 = vmatpush.bf16.msra.mxu3 %v2860_v22  ;;  %v2886_v62 = vld [vmem:[%s3870_s0 + $0x1a8] sm:$0xff]  ;;  %v2869_v7 = vld [vmem:[%s3870_s0 + $0x120] sm:$0xff]  ;;  %v2067_v12 = vor.u32 %v2785_v1, %v2064_v2  ;;  %v2868_v15 = vld [vmem:[%s3870_s0 + $0x118] sm:$0xff] }
  0x16   :  { %1482 = vmatpush.bf16.msra.mxu0 %v2835_v24  ;;  %351 = vperm.xlu0 %2963, %v341_v39   ;;  %v2894_v63 = vld [vmem:[%s3870_s0 + $0x1e8] sm:$0xff]  ;;  %v2877_v8 = vld [vmem:[%s3870_s0 + $0x160] sm:$0xff]  ;;  %v2876_v16 = vld [vmem:[%s3870_s0 + $0x158] sm:$0xff] }
  0x17   :  { %1511 = vmatpush.bf16.msra.mxu1 %v2843_v25  ;;  %v2070_v3 = vld [vmem:[%s3872_s1 + $0x88] sm:$0xf]  ;;  %v2786_v5 = vld [vmem:[%s3872_s1 + $0x8c] sm:$0xf]  ;;  %v2885_v9 = vld [vmem:[%s3870_s0 + $0x1a0] sm:$0xff] }
  0x18   :  { %1540 = vmatpush.bf16.msra.mxu2 %v2851_v26  ;;  %v2794_v4 = vld [vmem:[%s3872_s1 + $0xc4] sm:$0xf0]  ;;  %v2072_v6 = vld [vmem:[%s3872_s1 + $0xc8] sm:$0xf0]  ;;  %v2893_v10 = vld [vmem:[%s3870_s0 + $0x1e0] sm:$0xff] }
  0x19   :  { %1569 = vmatpush.bf16.msra.mxu3 %v2859_v27  ;;  %v2071_v13 = vor.u32 %v2794_v4, %v2070_v3  ;;  %v2075_v14 = vor.u32 %v2786_v5, %v2072_v6  ;;  %v2884_v17 = vld [vmem:[%s3870_s0 + $0x198] sm:$0xff]  ;;  %v343_v19 = vld [vmem:[%s3871_s2 + $0x10] sm:$0xff]  ;;  %v2866_v24 = vld [vmem:[%s3870_s0 + $0x108] sm:$0xff] }
  0x1a   :  { %1483 = vmatpush.bf16.msra.mxu0 %v2834_v29  ;;  %356 = vperm.xlu1 %2964, %v342_v48   ;;  %v2892_v18 = vld [vmem:[%s3870_s0 + $0x1d8] sm:$0xff]  ;;  %v2867_v20 = vld [vmem:[%s3870_s0 + $0x110] sm:$0xff]  ;;  %v2874_v25 = vld [vmem:[%s3870_s0 + $0x148] sm:$0xff] }
  0x1b   :  { %1512 = vmatpush.bf16.msra.mxu1 %v2842_v30  ;;  %v2875_v21 = vld [vmem:[%s3870_s0 + $0x150] sm:$0xff]  ;;  %361 = vperm.xlu2 %2965, %v343_v19   ;;  %v2126_v26 = vld [vmem:[%s3872_s1 + $0x100] sm:$0xf]  ;;  %v2882_v28 = vld [vmem:[%s3870_s0 + $0x188] sm:$0xff] }
  0x1c   :  { %1541 = vmatpush.bf16.msra.mxu2 %v2850_v31  ;;  %v2883_v22 = vld [vmem:[%s3870_s0 + $0x190] sm:$0xff]  ;;  %v2809_v27 = vld [vmem:[%s3872_s1 + $0x13c] sm:$0xf0]  ;;  %v2890_v29 = vld [vmem:[%s3870_s0 + $0x1c8] sm:$0xff] }
  0x1d   :  { %1570 = vmatpush.bf16.msra.mxu3 %v2858_v32  ;;  %v2891_v23 = vld [vmem:[%s3870_s0 + $0x1d0] sm:$0xff]  ;;  %v2801_v30 = vld [vmem:[%s3872_s1 + $0x104] sm:$0xf]  ;;  %v2134_v32 = vld [vmem:[%s3872_s1 + $0x108] sm:$0xf]  ;;  %v2127_v41 = vor.u32 %v2809_v27, %v2126_v26 }
  0x1e   :  { %1484 = vmatpush.bf16.msra.mxu0 %v2833_v33  ;;  %v2128_v31 = vld [vmem:[%s3872_s1 + $0x140] sm:$0xf0]  ;;  %v2810_v33 = vld [vmem:[%s3872_s1 + $0x144] sm:$0xf0]  ;;  %v2190_v45 = vld [vmem:[%s3872_s1 + $0x180] sm:$0xf] }
  0x1f   :  { %1513 = vmatpush.bf16.msra.mxu1 %v2841_v34  ;;  %v2802_v34 = vld [vmem:[%s3872_s1 + $0x10c] sm:$0xf]  ;;  %v2865_v37 = vld [vmem:[%s3870_s0 + $0x100] sm:$0xff]  ;;  %v2131_v42 = vor.u32 %v2801_v30, %v2128_v31  ;;  %v2135_v43 = vor.u32 %v2810_v33, %v2134_v32  ;;  %v2022_v61 = vld [vmem:[%s3872_s1 + $0x18] sm:$0xf] }
  0x20   :  { %1542 = vmatpush.bf16.msra.mxu2 %v2849_v35  ;;  %v344_v35 = vld [vmem:[%s3871_s2 + $0x18] sm:$0xff]  ;;  %v2873_v38 = vld [vmem:[%s3870_s0 + $0x140] sm:$0xff]  ;;  %v2787_v19 = vld [vmem:[%s3872_s1 + $0x94] sm:$0xf] }
  0x21   :  { %1571 = vmatpush.bf16.msra.mxu3 %v2857_v36  ;;  %1485 = vmatmul.bf16.vlgmr.msra.gmra.mxu0 %v1999_v46  ;;  %v2136_v36 = vld [vmem:[%s3872_s1 + $0x148] sm:$0xf0]  ;;  %v2881_v39 = vld [vmem:[%s3870_s0 + $0x180] sm:$0xff]  ;;  %v2024_v0 = vld [vmem:[%s3872_s1 + $0x58] sm:$0xf0] }
  0x22   :  { %1514 = vmatmul.bf16.vlgmr.msra.gmra.mxu1 %v2003_v47  ;;  %1593 = vmatpush.bf16.msrb.mxu0 %v2872_v51  ;;  %v2889_v40 = vld [vmem:[%s3870_s0 + $0x1c0] sm:$0xff]  ;;  %v2139_v44 = vor.u32 %v2802_v34, %v2136_v36  ;;  %v2818_v51 = vld [vmem:[%s3872_s1 + $0x18c] sm:$0xf]  ;;  %v2904_v5 = vld [vmem:[%s3870_s0 + $0x238] sm:$0xff] }
  0x23   :  { %1543 = vmatmul.bf16.vlgmr.msra.gmra.mxu2 %v2007_v49  ;;  %1622 = vmatpush.bf16.msrb.mxu1 %v2880_v52  ;;  %v2825_v46 = vld [vmem:[%s3872_s1 + $0x1bc] sm:$0xf0]  ;;  %v2817_v47 = vld [vmem:[%s3872_s1 + $0x184] sm:$0xf]  ;;  %v2198_v49 = vld [vmem:[%s3872_s1 + $0x188] sm:$0xf] }
  0x24   :  { %1572 = vmatmul.bf16.vlgmr.msra.gmra.mxu3 %v2011_v50  ;;  %1651 = vmatpush.bf16.msrb.mxu2 %v2888_v53  ;;  %v2192_v48 = vld [vmem:[%s3872_s1 + $0x1c0] sm:$0xf0]  ;;  %v2826_v50 = vld [vmem:[%s3872_s1 + $0x1c4] sm:$0xf0]  ;;  %v2200_v52 = vld [vmem:[%s3872_s1 + $0x1c8] sm:$0xf0]  ;;  %v2191_v53 = vor.u32 %v2825_v46, %v2190_v45 }
  0x25   :  { %1680 = vmatpush.bf16.msrb.mxu3 %v2896_v54  ;;  %366 = vperm.xlu2 %2965, %v344_v35   ;;  %v2195_v54 = vor.u32 %v2817_v47, %v2192_v48  ;;  %v2912_v6 = vld [vmem:[%s3870_s0 + $0x278] sm:$0xff]  ;;  %v2909_v26 = vld [vmem:[%s3870_s0 + $0x260] sm:$0xff]  ;;  %v2142_v45 = vld [vmem:[%s3872_s1 + $0x110] sm:$0xf] }
  0x26   :  { %1594 = vmatpush.bf16.msrb.mxu0 %v2871_v55  ;;  %v2199_v55 = vor.u32 %v2826_v50, %v2198_v49  ;;  %v2917_v27 = vld [vmem:[%s3870_s0 + $0x2a0] sm:$0xff]  ;;  %v2900_v33 = vld [vmem:[%s3870_s0 + $0x218] sm:$0xff]  ;;  %v2811_v46 = vld [vmem:[%s3872_s1 + $0x14c] sm:$0xf0] }
  0x27   :  { %1623 = vmatpush.bf16.msrb.mxu1 %v2879_v56  ;;  %v2203_v56 = vor.u32 %v2818_v51, %v2200_v52  ;;  %v2908_v34 = vld [vmem:[%s3870_s0 + $0x258] sm:$0xff]  ;;  %v2803_v47 = vld [vmem:[%s3872_s1 + $0x114] sm:$0xf] }
  0x28   :  { %1652 = vmatpush.bf16.msrb.mxu2 %v2887_v57  ;;  %v2014_v57 = vld [vmem:[%s3872_s1 + $0x10] sm:$0xf]  ;;  %v2916_v35 = vld [vmem:[%s3870_s0 + $0x298] sm:$0xff]  ;;  %v2144_v48 = vld [vmem:[%s3872_s1 + $0x150] sm:$0xf0] }
  0x29   :  { %1681 = vmatpush.bf16.msrb.mxu3 %v2895_v58  ;;  %v2779_v58 = vld [vmem:[%s3872_s1 + $0x4c] sm:$0xf0]  ;;  %v2924_v36 = vld [vmem:[%s3870_s0 + $0x2d8] sm:$0xff] }
  0x2a   :  { %1595 = vmatpush.bf16.msrb.mxu0 %v2870_v59  ;;  %v2771_v59 = vld [vmem:[%s3872_s1 + $0x14] sm:$0xf]  ;;  %v2015_v1 = vor.u32 %v2779_v58, %v2014_v57  ;;  %v2150_v49 = vld [vmem:[%s3872_s1 + $0x118] sm:$0xf]  ;;  %v2804_v51 = vld [vmem:[%s3872_s1 + $0x11c] sm:$0xf] }
  0x2b   :  { %1624 = vmatpush.bf16.msrb.mxu1 %v2878_v60  ;;  %v2016_v60 = vld [vmem:[%s3872_s1 + $0x50] sm:$0xf0]  ;;  %v2812_v50 = vld [vmem:[%s3872_s1 + $0x154] sm:$0xf0]  ;;  %v2152_v52 = vld [vmem:[%s3872_s1 + $0x158] sm:$0xf0] }
  0x2c   :  { %1653 = vmatpush.bf16.msrb.mxu2 %v2886_v62  ;;  %v2780_v62 = vld [vmem:[%s3872_s1 + $0x54] sm:$0xf0]  ;;  %v2019_v2 = vor.u32 %v2771_v59, %v2016_v60  ;;  %v2913_v57 = vld [vmem:[%s3870_s0 + $0x280] sm:$0xff]  ;;  %v2151_v58 = vor.u32 %v2812_v50, %v2150_v49  ;;  %v2155_v59 = vor.u32 %v2804_v51, %v2152_v52  ;;  %v2934_v50 = vld [vmem:[%s3870_s0 + $0x328] sm:$0xff] }
  0x2d   :  { %1682 = vmatpush.bf16.msrb.mxu3 %v2894_v63  ;;  %v2772_v63 = vld [vmem:[%s3872_s1 + $0x1c] sm:$0xf]  ;;  %v2023_v3 = vor.u32 %v2780_v62, %v2022_v61  ;;  %v2921_v60 = vld [vmem:[%s3870_s0 + $0x2c0] sm:$0xff]  ;;  %v2206_v62 = vld [vmem:[%s3872_s1 + $0x190] sm:$0xf] }
  0x2e   :  { %1596 = vmatpush.bf16.msrb.mxu0 %v2869_v7  ;;  %v2027_v4 = vor.u32 %v2772_v63, %v2024_v0  ;;  %v2920_v7 = vld [vmem:[%s3870_s0 + $0x2b8] sm:$0xff]  ;;  %v2827_v63 = vld [vmem:[%s3872_s1 + $0x1cc] sm:$0xf0]  ;;  %v2819_v0 = vld [vmem:[%s3872_s1 + $0x194] sm:$0xf] }
  0x2f   :  { %1625 = vmatpush.bf16.msrb.mxu1 %v2877_v8  ;;  %v2928_v8 = vld [vmem:[%s3870_s0 + $0x2f8] sm:$0xff]  ;;  %v2942_v51 = vld [vmem:[%s3870_s0 + $0x368] sm:$0xff] }
  0x30   :  { %1654 = vmatpush.bf16.msrb.mxu2 %v2885_v9  ;;  %v2903_v9 = vld [vmem:[%s3870_s0 + $0x230] sm:$0xff]  ;;  %v2950_v52 = vld [vmem:[%s3870_s0 + $0x3a8] sm:$0xff] }
  0x31   :  { %1683 = vmatpush.bf16.msrb.mxu3 %v2893_v10  ;;  %1490 = vmatmul.bf16.gmra.mxu0 %v2063_v11  ;;  %v2911_v10 = vld [vmem:[%s3870_s0 + $0x270] sm:$0xff] }
  0x32   :  { %1519 = vmatmul.bf16.gmra.mxu1 %v2067_v12  ;;  %1597 = vmatpush.bf16.msrb.mxu0 %v2868_v15  ;;  %v2919_v11 = vld [vmem:[%s3870_s0 + $0x2b0] sm:$0xff] }
  0x33   :  { %1548 = vmatmul.bf16.gmra.mxu2 %v2071_v13  ;;  %1626 = vmatpush.bf16.msrb.mxu1 %v2876_v16  ;;  %v2927_v12 = vld [vmem:[%s3870_s0 + $0x2f0] sm:$0xff]  ;;  %v2902_v13 = vld [vmem:[%s3870_s0 + $0x228] sm:$0xff] }
  0x34   :  { %1577 = vmatmul.bf16.gmra.mxu3 %v2075_v14  ;;  %1655 = vmatpush.bf16.msrb.mxu2 %v2884_v17  ;;  %v2910_v14 = vld [vmem:[%s3870_s0 + $0x268] sm:$0xff]  ;;  %v2078_v15 = vld [vmem:[%s3872_s1 + $0x90] sm:$0xf] }
  0x35   :  { %1684 = vmatpush.bf16.msrb.mxu3 %v2892_v18  ;;  %v2918_v16 = vld [vmem:[%s3870_s0 + $0x2a8] sm:$0xff]  ;;  %v2795_v18 = vld [vmem:[%s3872_s1 + $0xcc] sm:$0xf0] }
  0x36   :  { %1598 = vmatpush.bf16.msrb.mxu0 %v2867_v20  ;;  %v2926_v17 = vld [vmem:[%s3870_s0 + $0x2e8] sm:$0xff]  ;;  %v2080_v20 = vld [vmem:[%s3872_s1 + $0xd0] sm:$0xf0] }
  0x37   :  { %1627 = vmatpush.bf16.msrb.mxu1 %v2875_v21  ;;  %v2086_v21 = vld [vmem:[%s3872_s1 + $0x98] sm:$0xf]  ;;  %v2083_v30 = vor.u32 %v2787_v19, %v2080_v20  ;;  %v2774_v19 = vld [vmem:[%s3872_s1 + $0x2c] sm:$0xf] }
  0x38   :  { %1656 = vmatpush.bf16.msrb.mxu2 %v2883_v22  ;;  %v2796_v22 = vld [vmem:[%s3872_s1 + $0xd4] sm:$0xf0]  ;;  %v2040_v20 = vld [vmem:[%s3872_s1 + $0x68] sm:$0xf0] }
  0x39   :  { %1685 = vmatpush.bf16.msrb.mxu3 %v2891_v23  ;;  %v2788_v23 = vld [vmem:[%s3872_s1 + $0x9c] sm:$0xf]  ;;  %v2087_v31 = vor.u32 %v2796_v22, %v2086_v21 }
  0x3a   :  { %1599 = vmatpush.bf16.msrb.mxu0 %v2866_v24  ;;  %v2088_v24 = vld [vmem:[%s3872_s1 + $0xd8] sm:$0xf0] }
  0x3b   :  { %1628 = vmatpush.bf16.msrb.mxu1 %v2874_v25  ;;  %v2901_v25 = vld [vmem:[%s3870_s0 + $0x220] sm:$0xff]  ;;  %v2091_v32 = vor.u32 %v2788_v23, %v2088_v24 }
  0x3c   :  { %1657 = vmatpush.bf16.msrb.mxu2 %v2882_v28  ;;  %v2925_v28 = vld [vmem:[%s3870_s0 + $0x2e0] sm:$0xff] }
  0x3d   :  { %1686 = vmatpush.bf16.msrb.mxu3 %v2890_v29  ;;  %v2079_v29 = vor.u32 %v2795_v18, %v2078_v15  ;;  %v2773_v15 = vld [vmem:[%s3872_s1 + $0x24] sm:$0xf]  ;;  %v2782_v18 = vld [vmem:[%s3872_s1 + $0x64] sm:$0xf0] }
  0x3e   :  { %1600 = vmatpush.bf16.msrb.mxu0 %v2865_v37  ;;  %v2899_v37 = vld [vmem:[%s3870_s0 + $0x210] sm:$0xff] }
  0x3f   :  { %1629 = vmatpush.bf16.msrb.mxu1 %v2873_v38  ;;  %v2907_v38 = vld [vmem:[%s3870_s0 + $0x250] sm:$0xff] }
  0x40   :  { %1658 = vmatpush.bf16.msrb.mxu2 %v2881_v39  ;;  %v2915_v39 = vld [vmem:[%s3870_s0 + $0x290] sm:$0xff] }
  0x41   :  { %1687 = vmatpush.bf16.msrb.mxu3 %v2889_v40  ;;  %1495 = vmatmul.bf16.gmra.mxu0 %v2127_v41  ;;  %v2923_v40 = vld [vmem:[%s3870_s0 + $0x2d0] sm:$0xff]  ;;  %v2898_v41 = vld [vmem:[%s3870_s0 + $0x208] sm:$0xff] }
  0x42   :  { %1524 = vmatmul.bf16.gmra.mxu1 %v2131_v42  ;;  %1709 = vmatpush.bf16.msra.mxu0 %v2904_v5  ;;  %v2906_v42 = vld [vmem:[%s3870_s0 + $0x248] sm:$0xff]  ;;  %v2216_v5 = vld [vmem:[%s3872_s1 + $0x1d8] sm:$0xf0] }
  0x43   :  { %1553 = vmatmul.bf16.gmra.mxu2 %v2135_v43  ;;  %1738 = vmatpush.bf16.msra.mxu1 %v2912_v6  ;;  %v2914_v43 = vld [vmem:[%s3870_s0 + $0x288] sm:$0xff]  ;;  %v2207_v6 = vor.u32 %v2827_v63, %v2206_v62 }
  0x44   :  { %1582 = vmatmul.bf16.gmra.mxu3 %v2139_v44  ;;  %1767 = vmatpush.bf16.msra.mxu2 %v2920_v7  ;;  %v2922_v44 = vld [vmem:[%s3870_s0 + $0x2c8] sm:$0xff] }
  0x45   :  { %1796 = vmatpush.bf16.msra.mxu3 %v2928_v8 }
  0x46   :  { %1710 = vmatpush.bf16.msra.mxu0 %v2903_v9 }
  0x47   :  { %1739 = vmatpush.bf16.msra.mxu1 %v2911_v10 }
  0x48   :  { %1768 = vmatpush.bf16.msra.mxu2 %v2919_v11 }
  0x49   :  { %1797 = vmatpush.bf16.msra.mxu3 %v2927_v12  ;;  %v2030_v12 = vld [vmem:[%s3872_s1 + $0x20] sm:$0xf] }
  0x4a   :  { %1711 = vmatpush.bf16.msra.mxu0 %v2902_v13  ;;  %v2781_v13 = vld [vmem:[%s3872_s1 + $0x5c] sm:$0xf0] }
  0x4b   :  { %1740 = vmatpush.bf16.msra.mxu1 %v2910_v14  ;;  %v2031_v22 = vor.u32 %v2781_v13, %v2030_v12  ;;  %v2957_v12 = vld [vmem:[%s3870_s0 + $0x3e0] sm:$0xff] }
  0x4c   :  { %1769 = vmatpush.bf16.msra.mxu2 %v2918_v16  ;;  %v2032_v16 = vld [vmem:[%s3872_s1 + $0x60] sm:$0xf0] }
  0x4d   :  { %1798 = vmatpush.bf16.msra.mxu3 %v2926_v17  ;;  %v2038_v17 = vld [vmem:[%s3872_s1 + $0x28] sm:$0xf]  ;;  %v2035_v23 = vor.u32 %v2773_v15, %v2032_v16  ;;  %v2932_v16 = vld [vmem:[%s3870_s0 + $0x318] sm:$0xff] }
  0x4e   :  { %1712 = vmatpush.bf16.msra.mxu0 %v2901_v25 }
  0x4f   :  { %1741 = vmatpush.bf16.msra.mxu1 %v2909_v26  ;;  %v2039_v26 = vor.u32 %v2782_v18, %v2038_v17  ;;  %v2940_v17 = vld [vmem:[%s3870_s0 + $0x358] sm:$0xff] }
  0x50   :  { %1770 = vmatpush.bf16.msra.mxu2 %v2917_v27  ;;  %v2043_v27 = vor.u32 %v2774_v19, %v2040_v20  ;;  %v2948_v18 = vld [vmem:[%s3870_s0 + $0x398] sm:$0xff] }
  0x51   :  { %1500 = vmatmul.bf16.gmra.mxu0 %v2191_v53  ;;  %1799 = vmatpush.bf16.msra.mxu3 %v2925_v28  ;;  %v2143_v53 = vor.u32 %v2811_v46, %v2142_v45  ;;  %v2094_v46 = vld [vmem:[%s3872_s1 + $0xa0] sm:$0xf]  ;;  %v2956_v19 = vld [vmem:[%s3870_s0 + $0x3d8] sm:$0xff] }
  0x52   :  { %1529 = vmatmul.bf16.gmra.mxu1 %v2195_v54  ;;  %1713 = vmatpush.bf16.msra.mxu0 %v2900_v33  ;;  %v2147_v54 = vor.u32 %v2803_v47, %v2144_v48  ;;  %v2960_v33 = vld [vmem:[%s3870_s0 + $0x3f8] sm:$0xff]  ;;  %v2797_v47 = vld [vmem:[%s3872_s1 + $0xdc] sm:$0xf0]  ;;  %v2789_v48 = vld [vmem:[%s3872_s1 + $0xa4] sm:$0xf] }
  0x53   :  { %1558 = vmatmul.bf16.gmra.mxu2 %v2199_v55  ;;  %1742 = vmatpush.bf16.msra.mxu1 %v2908_v34  ;;  %v2897_v55 = vld [vmem:[%s3870_s0 + $0x200] sm:$0xff]  ;;  %v2095_v63 = vor.u32 %v2797_v47, %v2094_v46 }
  0x54   :  { %1587 = vmatmul.bf16.gmra.mxu3 %v2203_v56  ;;  %1771 = vmatpush.bf16.msra.mxu2 %v2916_v35  ;;  %v2905_v56 = vld [vmem:[%s3870_s0 + $0x240] sm:$0xff] }
  0x55   :  { %1800 = vmatpush.bf16.msra.mxu3 %v2924_v36 }
  0x56   :  { %1714 = vmatpush.bf16.msra.mxu0 %v2899_v37  ;;  %v2935_v37 = vld [vmem:[%s3870_s0 + $0x330] sm:$0xff] }
  0x57   :  { %1743 = vmatpush.bf16.msra.mxu1 %v2907_v38  ;;  %v2943_v38 = vld [vmem:[%s3870_s0 + $0x370] sm:$0xff] }
  0x58   :  { %1772 = vmatpush.bf16.msra.mxu2 %v2915_v39  ;;  %v2951_v39 = vld [vmem:[%s3870_s0 + $0x3b0] sm:$0xff] }
  0x59   :  { %1801 = vmatpush.bf16.msra.mxu3 %v2923_v40 }
  0x5a   :  { %1715 = vmatpush.bf16.msra.mxu0 %v2898_v41 }
  0x5b   :  { %1744 = vmatpush.bf16.msra.mxu1 %v2906_v42 }
  0x5c   :  { %1773 = vmatpush.bf16.msra.mxu2 %v2914_v43  ;;  %v2959_v43 = vld [vmem:[%s3870_s0 + $0x3f0] sm:$0xff] }
  0x5d   :  { %1802 = vmatpush.bf16.msra.mxu3 %v2922_v44 }
  0x5e   :  { %1716 = vmatpush.bf16.msra.mxu0 %v2897_v55  ;;  %v2102_v55 = vld [vmem:[%s3872_s1 + $0xa8] sm:$0xf] }
  0x5f   :  { %1745 = vmatpush.bf16.msra.mxu1 %v2905_v56  ;;  %v2958_v56 = vld [vmem:[%s3870_s0 + $0x3e8] sm:$0xff] }
  0x60   :  { %1774 = vmatpush.bf16.msra.mxu2 %v2913_v57  ;;  %v2798_v57 = vld [vmem:[%s3872_s1 + $0xe4] sm:$0xf0] }
  0x61   :  { %1601 = vmatmul.bf16.vlgmr.msrb.gmra.mxu0 %v2015_v1  ;;  %1803 = vmatpush.bf16.msra.mxu3 %v2921_v60  ;;  %v2208_v1 = vld [vmem:[%s3872_s1 + $0x1d0] sm:$0xf0] }
  0x62   :  { %1630 = vmatmul.bf16.vlgmr.msrb.gmra.mxu1 %v2019_v2  ;;  %v2214_v2 = vld [vmem:[%s3872_s1 + $0x198] sm:$0xf]  ;;  %v2211_v7 = vor.u32 %v2819_v0, %v2208_v1  ;;  %v2933_v1 = vld [vmem:[%s3870_s0 + $0x320] sm:$0xff] }
  0x63   :  { %1659 = vmatmul.bf16.vlgmr.msrb.gmra.mxu2 %v2023_v3  ;;  %v2828_v3 = vld [vmem:[%s3872_s1 + $0x1d4] sm:$0xf0] }
  0x64   :  { %1688 = vmatmul.bf16.vlgmr.msrb.gmra.mxu3 %v2027_v4  ;;  %v2820_v4 = vld [vmem:[%s3872_s1 + $0x19c] sm:$0xf]  ;;  %v2215_v8 = vor.u32 %v2828_v3, %v2214_v2  ;;  %v2941_v2 = vld [vmem:[%s3870_s0 + $0x360] sm:$0xff] }
  0x65   :  { %v2219_v9 = vor.u32 %v2820_v4, %v2216_v5  ;;  %1912 = vmatpush.bf16.msrb.mxu3 %v2960_v33  ;;  %v2949_v3 = vld [vmem:[%s3870_s0 + $0x3a0] sm:$0xff] }
  0x66   :  { %v2813_v33 = vld [vmem:[%s3872_s1 + $0x15c] sm:$0xf0] }
  0x69   :  { %1913 = vmatpush.bf16.msrb.mxu3 %v2959_v43  ;;  %v2168_v43 = vld [vmem:[%s3872_s1 + $0x168] sm:$0xf0] }
  0x6d   :  { %1914 = vmatpush.bf16.msrb.mxu3 %v2958_v56 }
  0x71   :  { %1606 = vmatmul.bf16.gmra.mxu0 %v2079_v29  ;;  %1915 = vmatpush.bf16.msrb.mxu3 %v2957_v12  ;;  %v2830_v12 = vld [vmem:[%s3872_s1 + $0x1e4] sm:$0xf0] }
  0x72   :  { %1635 = vmatmul.bf16.gmra.mxu1 %v2083_v30  ;;  %v2936_v30 = vld [vmem:[%s3870_s0 + $0x338] sm:$0xff] }
  0x73   :  { %1664 = vmatmul.bf16.gmra.mxu2 %v2087_v31  ;;  %v2944_v31 = vld [vmem:[%s3870_s0 + $0x378] sm:$0xff]  ;;  %1825 = vmatpush.bf16.msrb.mxu0 %v2936_v30  ;;  %v2955_v30 = vld [vmem:[%s3870_s0 + $0x3d0] sm:$0xff] }
  0x74   :  { %1693 = vmatmul.bf16.gmra.mxu3 %v2091_v32  ;;  %v2952_v32 = vld [vmem:[%s3870_s0 + $0x3b8] sm:$0xff]  ;;  %1854 = vmatpush.bf16.msrb.mxu1 %v2944_v31 }
  0x75   :  { %1883 = vmatpush.bf16.msrb.mxu2 %v2952_v32  ;;  %1916 = vmatpush.bf16.msrb.mxu3 %v2956_v19  ;;  %v2158_v32 = vld [vmem:[%s3872_s1 + $0x120] sm:$0xf] }
  0x77   :  { %1826 = vmatpush.bf16.msrb.mxu0 %v2935_v37  ;;  %v2938_v37 = vld [vmem:[%s3870_s0 + $0x348] sm:$0xff] }
  0x78   :  { %v3477_v61 = vpop.permute.xlu0 %381  ;;  %1855 = vmatpush.bf16.msrb.mxu1 %v2943_v38  ;;  %v2946_v38 = vld [vmem:[%s3870_s0 + $0x388] sm:$0xff] }
  0x79   :  { %1884 = vmatpush.bf16.msrb.mxu2 %v2951_v39  ;;  %v2160_v39 = vld [vmem:[%s3872_s1 + $0x160] sm:$0xf0]  ;;  %1917 = vmatpush.bf16.msrb.mxu3 %v2955_v30 }
  0x7b   :  { %1827 = vmatpush.bf16.msrb.mxu0 %v2934_v50  ;;  %v2929_v50 = vld [vmem:[%s3870_s0 + $0x300] sm:$0xff] }
  0x7c   :  { %v3503_v10 = vpop.permute.xlu1 %371  ;;  %1856 = vmatpush.bf16.msrb.mxu1 %v2942_v51  ;;  %v2937_v51 = vld [vmem:[%s3870_s0 + $0x340] sm:$0xff] }
  0x7d   :  { %1885 = vmatpush.bf16.msrb.mxu2 %v2950_v52  ;;  %v2945_v52 = vld [vmem:[%s3870_s0 + $0x380] sm:$0xff] }
  0x7f   :  { %1828 = vmatpush.bf16.msrb.mxu0 %v2933_v1 }
  0x80   :  { %v3505_v11 = vpop.permute.xlu0 %386  ;;  %1857 = vmatpush.bf16.msrb.mxu1 %v2941_v2 }
  0x81   :  { %1611 = vmatmul.bf16.gmra.mxu0 %v2143_v53  ;;  %v362_v53 = vpop.permute.xlu2 %361  ;;  %1886 = vmatpush.bf16.msrb.mxu2 %v2949_v3 }
  0x82   :  { %1640 = vmatmul.bf16.gmra.mxu1 %v2147_v54  ;;  %v2096_v54 = vld [vmem:[%s3872_s1 + $0xe0] sm:$0xf0] }
  0x83   :  { %1669 = vmatmul.bf16.gmra.mxu2 %v2151_v58  ;;  %v2790_v58 = vld [vmem:[%s3872_s1 + $0xac] sm:$0xf]  ;;  %v2099_v0 = vor.u32 %v2789_v48, %v2096_v54  ;;  %1829 = vmatpush.bf16.msrb.mxu0 %v2932_v16  ;;  %v2159_v48 = vor.u32 %v2813_v33, %v2158_v32 }
  0x84   :  { %1698 = vmatmul.bf16.gmra.mxu3 %v2155_v59  ;;  %v3513_v14 = vpop.permute.xlu1 %376  ;;  %v2104_v59 = vld [vmem:[%s3872_s1 + $0xe8] sm:$0xf0]  ;;  %1858 = vmatpush.bf16.msrb.mxu1 %v2940_v17 }
  0x85   :  { %1887 = vmatpush.bf16.msrb.mxu2 %v2948_v18  ;;  %v2232_v16 = vld [vmem:[%s3872_s1 + $0x1e8] sm:$0xf0] }
  0x88   :  { %v352_v21 = vpop.permute.xlu0 %351 }
  0x89   :  { %v367_v20 = vpop.permute.xlu2 %366 }
  0x8c   :  { %v357_v34 = vpop.permute.xlu1 %356 }
  0x91   :  { %1616 = vmatmul.bf16.gmra.mxu0 %v2207_v6 }
  0x92   :  { %1645 = vmatmul.bf16.gmra.mxu1 %v2211_v7  ;;  %v2103_v7 = vor.u32 %v2798_v57, %v2102_v55 }
  0x93   :  { %1674 = vmatmul.bf16.gmra.mxu2 %v2215_v8  ;;  %v2107_v8 = vor.u32 %v2790_v58, %v2104_v59  ;;  %v2953_v59 = vld [vmem:[%s3870_s0 + $0x3c0] sm:$0xff] }
  0x94   :  { %1703 = vmatmul.bf16.gmra.mxu3 %v2219_v9 }
  0x9e   :  { %v1486_v24 = vpop.f32.mrf.mxu0 }
  0x9f   :  { %v1515_v25 = vpop.f32.mrf.mxu1  ;;  %v1487_v28 = vadd.f32 %v1486_v24, %v352_v21  ;;  %v2939_v24 = vld [vmem:[%s3870_s0 + $0x350] sm:$0xff] }
  0xa0   :  { %1859 = vmatpush.bf16.msrb.mxu1 %v2939_v24 }
  0xa1   :  { %1717 = vmatmul.bf16.vlgmr.msra.gmra.mxu0 %v2031_v22  ;;  %v1516_v29 = vadd.f32 %v1515_v25, %v1487_v28  ;;  %v2947_v25 = vld [vmem:[%s3870_s0 + $0x390] sm:$0xff] }
  0xa2   :  { %1746 = vmatmul.bf16.vlgmr.msra.gmra.mxu1 %v2035_v23  ;;  %v2931_v23 = vld [vmem:[%s3870_s0 + $0x310] sm:$0xff]  ;;  %1888 = vmatpush.bf16.msrb.mxu2 %v2947_v25 }
  0xa3   :  { %1775 = vmatmul.bf16.vlgmr.msra.gmra.mxu2 %v2039_v26  ;;  %1830 = vmatpush.bf16.msrb.mxu0 %v2931_v23 }
  0xa4   :  { %1804 = vmatmul.bf16.vlgmr.msra.gmra.mxu3 %v2043_v27  ;;  %1860 = vmatpush.bf16.msrb.mxu1 %v2938_v37 }
  0xa6   :  { %v1544_v35 = vpop.f32.mrf.mxu2  ;;  %v1488_v41 = vpop.f32.mrf.mxu0  ;;  %1889 = vmatpush.bf16.msrb.mxu2 %v2946_v38  ;;  %v2783_v38 = vld [vmem:[%s3872_s1 + $0x6c] sm:$0xf0] }
  0xa7   :  { %v1573_v36 = vpop.f32.mrf.mxu3  ;;  %v1545_v40 = vadd.f32 %v1544_v35, %v1516_v29  ;;  %v1517_v42 = vpop.f32.mrf.mxu1  ;;  %v1489_v44 = vadd.f32 %v1488_v41, %v357_v34  ;;  %v2805_v34 = vld [vmem:[%s3872_s1 + $0x124] sm:$0xf]  ;;  %v2814_v41 = vld [vmem:[%s3872_s1 + $0x164] sm:$0xf0] }
  0xa8   :  { %1861 = vmatpush.bf16.msrb.mxu1 %v2937_v51 }
  0xa9   :  { %v3557_v45 = vadd.f32 %v1573_v36, %v1545_v40  ;;  %v1518_v49 = vadd.f32 %v1517_v42, %v1489_v44  ;;  %v2930_v36 = vld [vmem:[%s3870_s0 + $0x308] sm:$0xff] }
  0xaa   :  { %v2166_v40 = vld [vmem:[%s3872_s1 + $0x128] sm:$0xf]  ;;  %v2806_v42 = vld [vmem:[%s3872_s1 + $0x12c] sm:$0xf]  ;;  %1831 = vmatpush.bf16.msrb.mxu0 %v2930_v36  ;;  %1890 = vmatpush.bf16.msrb.mxu2 %v2945_v52 }
  0xab   :  { %v2954_v44 = vld [vmem:[%s3870_s0 + $0x3c8] sm:$0xff]  ;;  %v2167_v56 = vor.u32 %v2814_v41, %v2166_v40  ;;  %v2171_v57 = vor.u32 %v2806_v42, %v2168_v43  ;;  %v2048_v40 = vld [vmem:[%s3872_s1 + $0x70] sm:$0xf0]  ;;  %v2784_v41 = vld [vmem:[%s3872_s1 + $0x74] sm:$0xf0] }
  0xac   :  { %1918 = vmatpush.bf16.msrb.mxu3 %v2954_v44  ;;  %v2776_v42 = vld [vmem:[%s3872_s1 + $0x3c] sm:$0xf] }
  0xad   :  { %v2056_v43 = vld [vmem:[%s3872_s1 + $0x78] sm:$0xf0] }
  0xae   :  { %v1546_v60 = vpop.f32.mrf.mxu2  ;;  %v1491_v5 = vpop.f32.mrf.mxu0  ;;  %1832 = vmatpush.bf16.msrb.mxu0 %v2929_v50 }
  0xaf   :  { %v1575_v62 = vpop.f32.mrf.mxu3  ;;  %v1547_v4 = vadd.f32 %v1546_v60, %v1518_v49  ;;  %v1520_v6 = vpop.f32.mrf.mxu1  ;;  %v1492_v9 = vadd.f32 %v1491_v5, %v362_v53  ;;  %v2163_v49 = vor.u32 %v2805_v34, %v2160_v39  ;;  %v2775_v39 = vld [vmem:[%s3872_s1 + $0x34] sm:$0xf] }
  0xb0   :  { %1919 = vmatpush.bf16.msrb.mxu3 %v2953_v59 }
  0xb1   :  { %v3607_v13 = vadd.f32 %v1575_v62, %v1547_v4  ;;  %v1521_v15 = vadd.f32 %v1520_v6, %v1492_v9  ;;  %1722 = vmatmul.bf16.gmra.mxu0 %v2095_v63  ;;  %v2222_v6 = vld [vmem:[%s3872_s1 + $0x1a0] sm:$0xf]  ;;  %v2224_v9 = vld [vmem:[%s3872_s1 + $0x1e0] sm:$0xf0] }
  0xb2   :  { %1751 = vmatmul.bf16.gmra.mxu1 %v2099_v0 }
  0xb3   :  { %1780 = vmatmul.bf16.gmra.mxu2 %v2103_v7  ;;  %v2829_v7 = vld [vmem:[%s3872_s1 + $0x1dc] sm:$0xf0] }
  0xb4   :  { %1809 = vmatmul.bf16.gmra.mxu3 %v2107_v8  ;;  %v2821_v8 = vld [vmem:[%s3872_s1 + $0x1a4] sm:$0xf]  ;;  %v2223_v19 = vor.u32 %v2829_v7, %v2222_v6  ;;  %v2118_v6 = vld [vmem:[%s3872_s1 + $0xb8] sm:$0xf] }
  0xb5   :  { %v2800_v7 = vld [vmem:[%s3872_s1 + $0xf4] sm:$0xf0] }
  0xb6   :  { %v1549_v21 = vpop.f32.mrf.mxu2  ;;  %v1493_v27 = vpop.f32.mrf.mxu0 }
  0xb7   :  { %v1578_v22 = vpop.f32.mrf.mxu3  ;;  %v1550_v26 = vadd.f32 %v1549_v21, %v1521_v15  ;;  %v1522_v28 = vpop.f32.mrf.mxu1  ;;  %v1494_v29 = vadd.f32 %v1493_v27, %v367_v20  ;;  %v2822_v15 = vld [vmem:[%s3872_s1 + $0x1ac] sm:$0xf]  ;;  %v2227_v20 = vor.u32 %v2821_v8, %v2224_v9  ;;  %v2792_v8 = vld [vmem:[%s3872_s1 + $0xbc] sm:$0xf] }
  0xb8   :  { %v2235_v25 = vor.u32 %v2822_v15, %v2232_v16  ;;  %v2120_v9 = vld [vmem:[%s3872_s1 + $0xf8] sm:$0xf0] }
  0xb9   :  { %v3633_v31 = vadd.f32 %v1578_v22, %v1550_v26  ;;  %v1523_v35 = vadd.f32 %v1522_v28, %v1494_v29 }
  0xbe   :  { %v1551_v46 = vpop.f32.mrf.mxu2  ;;  %v1496_v54 = vpop.f32.mrf.mxu0 }
  0xbf   :  { %v1580_v47 = vpop.f32.mrf.mxu3  ;;  %v1552_v53 = vadd.f32 %v1551_v46, %v1523_v35  ;;  %v1525_v55 = vpop.f32.mrf.mxu1  ;;  %v1497_v58 = vadd.f32 %v1496_v54, %v3503_v10 }
  0xc1   :  { %v3684_v60 = vadd.f32 %v1580_v47, %v1552_v53  ;;  %v1526_v62 = vadd.f32 %v1525_v55, %v1497_v58  ;;  %1727 = vmatmul.bf16.gmra.mxu0 %v2159_v48  ;;  %v2051_v48 = vor.u32 %v2775_v39, %v2048_v40  ;;  %v2059_v53 = vor.u32 %v2776_v42, %v2056_v43  ;;  %v2808_v39 = vld [vmem:[%s3872_s1 + $0x13c] sm:$0xf] }
  0xc2   :  { %1756 = vmatmul.bf16.gmra.mxu1 %v2163_v49  ;;  %v2184_v40 = vld [vmem:[%s3872_s1 + $0x178] sm:$0xf0] }
  0xc3   :  { %1785 = vmatmul.bf16.gmra.mxu2 %v2167_v56 }
  0xc4   :  { %1814 = vmatmul.bf16.gmra.mxu3 %v2171_v57 }
  0xc6   :  { %v1554_v63 = vpop.f32.mrf.mxu2  ;;  %v1498_v10 = vpop.f32.mrf.mxu0 }
  0xc7   :  { %v1583_v0 = vpop.f32.mrf.mxu3  ;;  %v1555_v1 = vadd.f32 %v1554_v63, %v1526_v62  ;;  %v1527_v2 = vpop.f32.mrf.mxu1  ;;  %v1499_v3 = vadd.f32 %v1498_v10, %v3513_v14  ;;  %v2230_v14 = vld [vmem:[%s3872_s1 + $0x1a8] sm:$0xf] }
  0xc8   :  { %v2231_v24 = vor.u32 %v2830_v12, %v2230_v14 }
  0xc9   :  { %v3687_v4 = vadd.f32 %v1583_v0, %v1555_v1  ;;  %v1528_v5 = vadd.f32 %v1527_v2, %v1499_v3  ;;  %v1956_v0 = vld [vmem:[%s3873_s4 + $0x8] sm:$0x3]  ;;  %v2110_v2 = vld [vmem:[%s3872_s1 + $0xb0] sm:$0xf] }
  0xca   :  { %1964 = vperm.xlu0 %2963, %v1956_v0   ;;  %v2799_v3 = vld [vmem:[%s3872_s1 + $0xec] sm:$0xf0] }
  0xcb   :  { %v2111_v15 = vor.u32 %v2799_v3, %v2110_v2  ;;  %v2238_v0 = vld [vmem:[%s3872_s1 + $0x1b0] sm:$0xf]  ;;  %v2246_v2 = vld [vmem:[%s3872_s1 + $0x1b8] sm:$0xf] }
  0xcc   :  { %v2832_v3 = vld [vmem:[%s3872_s1 + $0x1f4] sm:$0xf0] }
  0xce   :  { %v1556_v17 = vpop.f32.mrf.mxu2  ;;  %v1501_v22 = vpop.f32.mrf.mxu0 }
  0xcf   :  { %v1585_v18 = vpop.f32.mrf.mxu3  ;;  %v1557_v21 = vadd.f32 %v1556_v17, %v1528_v5  ;;  %v1530_v23 = vpop.f32.mrf.mxu1  ;;  %v1502_v26 = vadd.f32 %v1501_v22, %v3477_v61  ;;  %v2046_v61 = vld [vmem:[%s3872_s1 + $0x30] sm:$0xf]  ;;  %v2791_v5 = vld [vmem:[%s3872_s1 + $0xb4] sm:$0xf] }
  0xd0   :  { %v2047_v47 = vor.u32 %v2783_v38, %v2046_v61  ;;  %v2176_v61 = vld [vmem:[%s3872_s1 + $0x170] sm:$0xf0]  ;;  %v2816_v38 = vld [vmem:[%s3872_s1 + $0x174] sm:$0xf0] }
  0xd1   :  { %v3714_v27 = vadd.f32 %v1585_v18, %v1557_v21  ;;  %v1531_v28 = vadd.f32 %v1530_v23, %v1502_v26  ;;  %1732 = vmatmul.bf16.gmra.mxu0 %v2223_v19  ;;  %v2123_v21 = vor.u32 %v2792_v8, %v2120_v9 }
  0xd2   :  { %1761 = vmatmul.bf16.gmra.mxu1 %v2227_v20  ;;  %v2119_v20 = vor.u32 %v2800_v7, %v2118_v6 }
  0xd3   :  { %1790 = vmatmul.bf16.gmra.mxu2 %v2231_v24 }
  0xd4   :  { %1819 = vmatmul.bf16.gmra.mxu3 %v2235_v25 }
  0xd6   :  { %v1559_v29 = vpop.f32.mrf.mxu2  ;;  %v1503_v33 = vpop.f32.mrf.mxu0 }
  0xd7   :  { %v1588_v30 = vpop.f32.mrf.mxu3  ;;  %v1560_v32 = vadd.f32 %v1559_v29, %v1531_v28  ;;  %v1532_v34 = vpop.f32.mrf.mxu1  ;;  %v1504_v35 = vadd.f32 %v1503_v33, %v3505_v11  ;;  %v2054_v11 = vld [vmem:[%s3872_s1 + $0x38] sm:$0xf] }
  0xd8   :  { %v2055_v52 = vor.u32 %v2784_v41, %v2054_v11 }
  0xd9   :  { %v3717_v36 = vadd.f32 %v1588_v30, %v1560_v32  ;;  %v1533_v37 = vadd.f32 %v1532_v34, %v1504_v35  ;;  %v2815_v35 = vld [vmem:[%s3872_s1 + $0x16c] sm:$0xf0] }
  0xde   :  { %v1561_v44 = vpop.f32.mrf.mxu2  ;;  %v1602_v50 = vpop.f32.mrf.mxu0 }
  0xdf   :  { %v1590_v46 = vpop.f32.mrf.mxu3  ;;  %v1562_v49 = vadd.f32 %v1561_v44, %v1533_v37  ;;  %v1631_v51 = vpop.f32.mrf.mxu1  ;;  %v1603_v54 = vadd.f32 %v1602_v50, %v3557_v45  ;;  %v2807_v37 = vld [vmem:[%s3872_s1 + $0x134] sm:$0xf] }
  0xe0   :  { %v2179_v43 = vor.u32 %v2807_v37, %v2176_v61 }
  0xe1   :  { %v3744_v55 = vadd.f32 %v1590_v46, %v1562_v49  ;;  %v1632_v56 = vadd.f32 %v1631_v51, %v1603_v54  ;;  %1833 = vmatmul.bf16.vlgmr.msrb.gmra.mxu0 %v2047_v47  ;;  %v2187_v49 = vor.u32 %v2808_v39, %v2184_v40 }
  0xe2   :  { %1862 = vmatmul.bf16.vlgmr.msrb.gmra.mxu1 %v2051_v48 }
  0xe3   :  { %1891 = vmatmul.bf16.vlgmr.msrb.gmra.mxu2 %v2055_v52 }
  0xe4   :  { %1920 = vmatmul.bf16.vlgmr.msrb.gmra.mxu3 %v2059_v53 }
  0xe6   :  { %v1660_v57 = vpop.f32.mrf.mxu2  ;;  %v1604_v62 = vpop.f32.mrf.mxu0 }
  0xe7   :  { %v1689_v58 = vpop.f32.mrf.mxu3  ;;  %v1661_v59 = vadd.f32 %v1660_v57, %v1632_v56  ;;  %v1633_v63 = vpop.f32.mrf.mxu1  ;;  %v1605_v1 = vadd.f32 %v1604_v62, %v3607_v13  ;;  %v2112_v13 = vld [vmem:[%s3872_s1 + $0xf0] sm:$0xf0] }
  0xe8   :  { %v2115_v16 = vor.u32 %v2791_v5, %v2112_v13  ;;  %v2824_v5 = vld [vmem:[%s3872_s1 + $0x1bc] sm:$0xf] }
  0xe9   :  { %v3750_v45 = vadd.f32 %v1689_v58, %v1661_v59  ;;  %v1634_v10 = vadd.f32 %v1633_v63, %v1605_v1  ;;  %v1955_v59 = vld [vmem:[%s3873_s4] sm:$0xff]  ;;  %v2831_v1 = vld [vmem:[%s3872_s1 + $0x1ec] sm:$0xf0]  ;;  %v2248_v13 = vld [vmem:[%s3872_s1 + $0x1f8] sm:$0xf0] }
  0xea   :  { %1959 = vperm.xlu2 %2965, %v1955_v59   ;;  %v2239_v8 = vor.u32 %v2831_v1, %v2238_v0 }
  0xee   :  { %v1662_v14 = vpop.f32.mrf.mxu2  ;;  %v1607_v18 = vpop.f32.mrf.mxu0 }
  0xef   :  { %v1691_v12 = vpop.f32.mrf.mxu3  ;;  %v1663_v17 = vadd.f32 %v1662_v14, %v1634_v10  ;;  %v1636_v19 = vpop.f32.mrf.mxu1  ;;  %v1608_v22 = vadd.f32 %v1607_v18, %v3633_v31  ;;  %v2174_v31 = vld [vmem:[%s3872_s1 + $0x130] sm:$0xf]  ;;  %v2823_v10 = vld [vmem:[%s3872_s1 + $0x1b4] sm:$0xf] }
  0xf0   :  { %v2175_v42 = vor.u32 %v2815_v35, %v2174_v31 }
  0xf1   :  { %v3777_v23 = vadd.f32 %v1691_v12, %v1663_v17  ;;  %v1637_v24 = vadd.f32 %v1636_v19, %v1608_v22  ;;  %1838 = vmatmul.bf16.gmra.mxu0 %v2111_v15  ;;  %v2251_v17 = vor.u32 %v2824_v5, %v2248_v13 }
  0xf2   :  { %1867 = vmatmul.bf16.gmra.mxu1 %v2115_v16  ;;  %v2247_v16 = vor.u32 %v2832_v3, %v2246_v2 }
  0xf3   :  { %1896 = vmatmul.bf16.gmra.mxu2 %v2119_v20 }
  0xf4   :  { %1925 = vmatmul.bf16.gmra.mxu3 %v2123_v21 }
  0xf6   :  { %v1665_v25 = vpop.f32.mrf.mxu2  ;;  %v1609_v29 = vpop.f32.mrf.mxu0 }
  0xf7   :  { %v1694_v26 = vpop.f32.mrf.mxu3  ;;  %v1666_v28 = vadd.f32 %v1665_v25, %v1637_v24  ;;  %v1638_v30 = vpop.f32.mrf.mxu1  ;;  %v1610_v32 = vadd.f32 %v1609_v29, %v3684_v60  ;;  %v2182_v60 = vld [vmem:[%s3872_s1 + $0x138] sm:$0xf] }
  0xf8   :  { %v2183_v48 = vor.u32 %v2816_v38, %v2182_v60 }
  0xf9   :  { %v3780_v33 = vadd.f32 %v1694_v26, %v1666_v28  ;;  %v1639_v34 = vadd.f32 %v1638_v30, %v1610_v32 }
  0xfe   :  { %v1667_v11 = vpop.f32.mrf.mxu2  ;;  %v1612_v46 = vpop.f32.mrf.mxu0 }
  0xff   :  { %v1696_v41 = vpop.f32.mrf.mxu3  ;;  %v1668_v44 = vadd.f32 %v1667_v11, %v1639_v34  ;;  %v1641_v47 = vpop.f32.mrf.mxu1  ;;  %v1613_v50 = vadd.f32 %v1612_v46, %v3687_v4 }
 0x101   :  { %v3807_v51 = vadd.f32 %v1696_v41, %v1668_v44  ;;  %v1642_v52 = vadd.f32 %v1641_v47, %v1613_v50  ;;  %1843 = vmatmul.bf16.gmra.mxu0 %v2175_v42 }
 0x102   :  { %1872 = vmatmul.bf16.gmra.mxu1 %v2179_v43 }
 0x103   :  { %1901 = vmatmul.bf16.gmra.mxu2 %v2183_v48 }
 0x104   :  { %1930 = vmatmul.bf16.gmra.mxu3 %v2187_v49 }
 0x106   :  { %v1670_v53 = vpop.f32.mrf.mxu2  ;;  %v1614_v57 = vpop.f32.mrf.mxu0 }
 0x107   :  { %v1699_v54 = vpop.f32.mrf.mxu3  ;;  %v1671_v56 = vadd.f32 %v1670_v53, %v1642_v52  ;;  %v1643_v58 = vpop.f32.mrf.mxu1  ;;  %v1615_v62 = vadd.f32 %v1614_v57, %v3714_v27  ;;  %v2240_v27 = vld [vmem:[%s3872_s1 + $0x1f0] sm:$0xf0] }
 0x108   :  { %v2243_v9 = vor.u32 %v2823_v10, %v2240_v27 }
 0x109   :  { %v3813_v4 = vadd.f32 %v1699_v54, %v1671_v56  ;;  %v1644_v63 = vadd.f32 %v1643_v58, %v1615_v62 }
 0x10e   :  { %v1672_v6 = vpop.f32.mrf.mxu2  ;;  %v1617_v12 = vpop.f32.mrf.mxu0 }
 0x10f   :  { %v1701_v7 = vpop.f32.mrf.mxu3  ;;  %v1673_v14 = vadd.f32 %v1672_v6, %v1644_v63  ;;  %v1646_v15 = vpop.f32.mrf.mxu1  ;;  %v1618_v18 = vadd.f32 %v1617_v12, %v3717_v36 }
 0x111   :  { %v1702_v19 = vadd.f32 %v1701_v7, %v1673_v14  ;;  %v1647_v20 = vadd.f32 %v1646_v15, %v1618_v18  ;;  %1848 = vmatmul.bf16.gmra.mxu0 %v2239_v8 }
 0x112   :  { %1877 = vmatmul.bf16.gmra.mxu1 %v2243_v9 }
 0x113   :  { %1906 = vmatmul.bf16.gmra.mxu2 %v2247_v16 }
 0x114   :  { %1935 = vmatmul.bf16.gmra.mxu3 %v2251_v17 }
 0x116   :  { %v1675_v21 = vpop.f32.mrf.mxu2  ;;  %v1619_v25 = vpop.f32.mrf.mxu0 }
 0x117   :  { %v1704_v22 = vpop.f32.mrf.mxu3  ;;  %v1676_v24 = vadd.f32 %v1675_v21, %v1647_v20  ;;  %v1648_v26 = vpop.f32.mrf.mxu1  ;;  %v1620_v28 = vadd.f32 %v1619_v25, %v3744_v55 }
 0x119   :  { %v1705_v29 = vadd.f32 %v1704_v22, %v1676_v24  ;;  %v1649_v30 = vadd.f32 %v1648_v26, %v1620_v28 }
 0x11e   :  { %v1677_v32 = vpop.f32.mrf.mxu2  ;;  %v1718_v35 = vpop.f32.mrf.mxu0 }
 0x11f   :  { %v1706_v34 = vpop.f32.mrf.mxu3  ;;  %v1678_v31 = vadd.f32 %v1677_v32, %v1649_v30  ;;  %v1747_v36 = vpop.f32.mrf.mxu1  ;;  %v1719_v37 = vadd.f32 %v1718_v35, %v3750_v45 }
 0x121   :  { %v3842_v61 = vadd.f32 %v1706_v34, %v1678_v31  ;;  %v1748_v60 = vadd.f32 %v1747_v36, %v1719_v37 }
 0x126   :  { %v1776_v38 = vpop.f32.mrf.mxu2  ;;  %v1720_v11 = vpop.f32.mrf.mxu0 }
 0x127   :  { %v1805_v39 = vpop.f32.mrf.mxu3  ;;  %v1777_v40 = vadd.f32 %v1776_v38, %v1748_v60  ;;  %v1749_v41 = vpop.f32.mrf.mxu1  ;;  %v1721_v42 = vadd.f32 %v1720_v11, %v3777_v23 }
 0x129   :  { %v1806_v55 = vadd.f32 %v1805_v39, %v1777_v40  ;;  %v1750_v43 = vadd.f32 %v1749_v41, %v1721_v42 }
 0x12e   :  { %v1778_v44 = vpop.f32.mrf.mxu2  ;;  %v1723_v48 = vpop.f32.mrf.mxu0 }
 0x12f   :  { %v1807_v46 = vpop.f32.mrf.mxu3  ;;  %v1779_v47 = vadd.f32 %v1778_v44, %v1750_v43  ;;  %v1752_v49 = vpop.f32.mrf.mxu1  ;;  %v1724_v50 = vadd.f32 %v1723_v48, %v3780_v33 }
 0x131   :  { %v1808_v45 = vadd.f32 %v1807_v46, %v1779_v47  ;;  %v1753_v52 = vadd.f32 %v1752_v49, %v1724_v50 }
 0x136   :  { %v1781_v53 = vpop.f32.mrf.mxu2  ;;  %v1725_v57 = vpop.f32.mrf.mxu0 }
 0x137   :  { %v1810_v54 = vpop.f32.mrf.mxu3  ;;  %v1782_v56 = vadd.f32 %v1781_v53, %v1753_v52  ;;  %v1754_v58 = vpop.f32.mrf.mxu1  ;;  %v1726_v59 = vadd.f32 %v1725_v57, %v3807_v51 }
 0x139   :  { %v1811_v62 = vadd.f32 %v1810_v54, %v1782_v56  ;;  %v1755_v23 = vadd.f32 %v1754_v58, %v1726_v59 }
 0x13e   :  { %v1783_v63 = vpop.f32.mrf.mxu2  ;;  %v1728_v10 = vpop.f32.mrf.mxu0 }
 0x13f   :  { %v1812_v0 = vpop.f32.mrf.mxu3  ;;  %v1784_v1 = vadd.f32 %v1783_v63, %v1755_v23  ;;  %v1757_v27 = vpop.f32.mrf.mxu1  ;;  %v1729_v2 = vadd.f32 %v1728_v10, %v3813_v4 }
 0x141   :  { %v1813_v3 = vadd.f32 %v1812_v0, %v1784_v1  ;;  %v1758_v33 = vadd.f32 %v1757_v27, %v1729_v2 }
 0x146   :  { %v1786_v5 = vpop.f32.mrf.mxu2  ;;  %v1730_v7 = vpop.f32.mrf.mxu0 }
 0x147   :  { %v1815_v13 = vpop.f32.mrf.mxu3  ;;  %v1787_v6 = vadd.f32 %v1786_v5, %v1758_v33  ;;  %v1759_v8 = vpop.f32.mrf.mxu1  ;;  %v1731_v9 = vadd.f32 %v1730_v7, %v1702_v19 }
 0x149   :  { %v1816_v14 = vadd.f32 %v1815_v13, %v1787_v6  ;;  %v1760_v12 = vadd.f32 %v1759_v8, %v1731_v9 }
 0x14e   :  { %v1788_v51 = vpop.f32.mrf.mxu2  ;;  %v1733_v17 = vpop.f32.mrf.mxu0 }
 0x14f   :  { %v1817_v15 = vpop.f32.mrf.mxu3  ;;  %v1789_v16 = vadd.f32 %v1788_v51, %v1760_v12  ;;  %v1762_v18 = vpop.f32.mrf.mxu1  ;;  %v1734_v20 = vadd.f32 %v1733_v17, %v1705_v29 }
 0x151   :  { %v1818_v21 = vadd.f32 %v1817_v15, %v1789_v16  ;;  %v1763_v22 = vadd.f32 %v1762_v18, %v1734_v20 }
 0x156   :  { %v1791_v24 = vpop.f32.mrf.mxu2  ;;  %v1735_v26 = vpop.f32.mrf.mxu0 }
 0x157   :  { %v1820_v4 = vpop.f32.mrf.mxu3  ;;  %v1792_v25 = vadd.f32 %v1791_v24, %v1763_v22  ;;  %v1764_v28 = vpop.f32.mrf.mxu1  ;;  %v1736_v16 = vadd.f32 %v1735_v26, %v3842_v61 }
 0x159   :  { %v3848_v30 = vadd.f32 %v1820_v4, %v1792_v25  ;;  %v1765_v25 = vadd.f32 %v1764_v28, %v1736_v16 }
 0x15e   :  { %v1793_v32 = vpop.f32.mrf.mxu2  ;;  %v1834_v19 = vpop.f32.mrf.mxu0 }
 0x15f   :  { %v3850_v34 = vpop.f32.mrf.mxu3  ;;  %v1863_v31 = vpop.f32.mrf.mxu1  ;;  %v1835_v35 = vadd.f32 %v1834_v19, %v1806_v55 }
 0x161   :  { %v1864_v36 = vadd.f32 %v1863_v31, %v1835_v35  ;;  %v1794_v35 = vadd.f32 %v1793_v32, %v1765_v25 }
 0x166   :  { %v1892_v37 = vpop.f32.mrf.mxu2  ;;  %v1836_v29 = vpop.f32.mrf.mxu0 }
 0x167   :  { %v1921_v60 = vpop.f32.mrf.mxu3  ;;  %v1893_v38 = vadd.f32 %v1892_v37, %v1864_v36  ;;  %v1865_v39 = vpop.f32.mrf.mxu1  ;;  %v1837_v11 = vadd.f32 %v1836_v29, %v1808_v45  ;;  %v1823_v29 = vadd.f32 %v3850_v34, %v1794_v35  ;;  %v2961_v34 = vld [vmem:[%s3874_s3] sm:$0x10] }
 0x169   :  { %v1922_v40 = vadd.f32 %v1921_v60, %v1893_v38  ;;  %v1866_v41 = vadd.f32 %v1865_v39, %v1837_v11 }
 0x16b   :  { %v1941_v49 = vmax.f32 %v1922_v40, 0.0 }
 0x16e   :  { %v1894_v42 = vpop.f32.mrf.mxu2  ;;  %v1839_v46 = vpop.f32.mrf.mxu0 }
 0x16f   :  { %v1923_v43 = vpop.f32.mrf.mxu3  ;;  %v1895_v44 = vadd.f32 %v1894_v42, %v1866_v41  ;;  %v1868_v47 = vpop.f32.mrf.mxu1  ;;  %v1840_v55 = vadd.f32 %v1839_v46, %v1811_v62 }
 0x171   :  { %v1924_v48 = vadd.f32 %v1923_v43, %v1895_v44  ;;  %v1869_v58 = vadd.f32 %v1868_v47, %v1840_v55 }
 0x173   :  { %v1942_v50 = vmax.f32 %v1924_v48, 0.0 }
 0x175   :  { %v3852_v52 = vpack.c.bf16 %v1942_v50, %v1941_v49  ;;  %v1960_v50 = vpop.permute.xlu2 %1959 }
 0x176   :  { %v1897_v53 = vpop.f32.mrf.mxu2  ;;  %v1841_v56 = vpop.f32.mrf.mxu0 }
 0x177   :  { %v1926_v54 = vpop.f32.mrf.mxu3  ;;  %v1870_v57 = vpop.f32.mrf.mxu1  ;;  %v1842_v59 = vadd.f32 %v1841_v56, %v1813_v3  ;;  %v1898_v23 = vadd.f32 %v1897_v53, %v1869_v58 }
 0x179   :  { %v1871_v45 = vadd.f32 %v1870_v57, %v1842_v59  ;;  %v1927_v1 = vadd.f32 %v1926_v54, %v1898_v23  ;;  %v1965_v54 = vpop.permute.xlu0 %1964 }
 0x17b   :  { %v1943_v5 = vmax.f32 %v1927_v1, 0.0 }
 0x17e   :  { %v1899_v63 = vpop.f32.mrf.mxu2  ;;  %v1844_v27 = vpop.f32.mrf.mxu0 }
 0x17f   :  { %v1928_v0 = vpop.f32.mrf.mxu3  ;;  %v1900_v10 = vadd.f32 %v1899_v63, %v1871_v45  ;;  %v1873_v2 = vpop.f32.mrf.mxu1  ;;  %v1845_v7 = vadd.f32 %v1844_v27, %v1816_v14 }
 0x181   :  { %v1929_v33 = vadd.f32 %v1928_v0, %v1900_v10  ;;  %v1874_v51 = vadd.f32 %v1873_v2, %v1845_v7 }
 0x183   :  { %v1944_v13 = vmax.f32 %v1929_v33, 0.0 }
 0x185   :  { %v1952_v6 = vpack.c.bf16 %v1944_v13, %v1943_v5 }
 0x186   :  { %v1902_v62 = vpop.f32.mrf.mxu2  ;;  %v1846_v9 = vpop.f32.mrf.mxu0 }
 0x187   :  { %v1931_v8 = vpop.f32.mrf.mxu3  ;;  %v1875_v12 = vpop.f32.mrf.mxu1  ;;  %v1847_v15 = vadd.f32 %v1846_v9, %v1818_v21  ;;  %v1903_v3 = vadd.f32 %v1902_v62, %v1874_v51 }
 0x189   :  { %v1876_v17 = vadd.f32 %v1875_v12, %v1847_v15  ;;  %v1932_v22 = vadd.f32 %v1931_v8, %v1903_v3 }
 0x18b   :  { %v1945_v14 = vmax.f32 %v1932_v22, 0.0 }
 0x18e   :  { %v1904_v18 = vpop.f32.mrf.mxu2  ;;  %v1849_v4 = vpop.f32.mrf.mxu0 }
 0x18f   :  { %v1933_v20 = vpop.f32.mrf.mxu3  ;;  %v1905_v24 = vadd.f32 %v1904_v18, %v1876_v17  ;;  %v1878_v31 = vpop.f32.mrf.mxu1  ;;  %v1850_v60 = vadd.f32 %v1849_v4, %v3848_v30  ;;  %v2766_v30 = vld [vmem:[%s3874_s3] sm:$0xf] }
 0x190   :  { %v2767_v49 = vor.u32 %v2961_v34, %v2766_v30 }
 0x191   :  { %v1934_v19 = vadd.f32 %v1933_v20, %v1905_v24  ;;  %v1879_v26 = vadd.f32 %v1878_v31, %v1850_v60 }
 0x193   :  { %v1946_v36 = vmax.f32 %v1934_v19, 0.0 }
 0x195   :  { %v1953_v37 = vpack.c.bf16 %v1946_v36, %v1945_v14 }
 0x196   :  { %v1907_v38 = vpop.f32.mrf.mxu2  ;;  %v1851_v61 = vpop.f32.mrf.mxu0 }
 0x197   :  { %v1936_v21 = vpop.f32.mrf.mxu3  ;;  %v1852_v39 = vadd.f32 %v1851_v61, %v1823_v29  ;;  %v1908_v40 = vadd.f32 %v1907_v38, %v1879_v26  ;;  %v1880_v11 = vpop.f32.mrf.mxu1 }
 0x199   :  { %v1881_v41 = vadd.f32 %v1880_v11, %v1852_v39  ;;  %v1937_v28 = vadd.f32 %v1936_v21, %v1908_v40 }
 0x19b   :  { %v1947_v46 = vmax.f32 %v1937_v28, 0.0 }
 0x19e   :  { %v1909_v42 = vpop.f32.mrf.mxu2 }
 0x19f   :  { %v1910_v43 = vadd.f32 %v1909_v42, %v1881_v41  ;;  %v1938_v44 = vpop.f32.mrf.mxu3 }
 0x1a1   :  { %v1939_v32 = vadd.f32 %v1938_v44, %v1910_v43 }
 0x1a3   :  { %v1948_v47 = vmax.f32 %v1939_v32, 0.0 }
 0x1a5   :  { %v1954_v48 = vpack.c.bf16 %v1948_v47, %v1947_v46 }
 0x1a7   :  { %1980 = vmatpush.bf16.msra.mxu0 %v1954_v48 }
 0x1ab   :  { %1981 = vmatpush.bf16.msra.mxu0 %v1953_v37 }
 0x1af   :  { %1982 = vmatpush.bf16.msra.mxu0 %v1952_v6 }
 0x1b3   :  { %1983 = vmatpush.bf16.msra.mxu0 %v3852_v52 }
 0x1b6   :  { %2768 = vmatmul.msk.bf16.vlgmr.msra.gmra.mxu0 %vm1972_vm0, %v2767_v49 }
 0x233   :  { %v1985_v55 = vpop.f32.mrf.mxu0 }
 0x234   :  { %v1986_v53 = vadd.f32 %v1985_v55, %v1960_v50 }
 0x236   :  { %1990 = vst [vmem:[%s3875_s5] sm:$0xff] %v1986_v53 }
 0x23b   :  { %v1987_v56 = vpop.f32.mrf.mxu0 }
 0x23c   :  { %v1988_v57 = vadd.f32 %v1987_v56, %v1965_v54 }
 0x23e   :  { %1991 = vst [vmem:[%s3875_s5 + $0x8] sm:$0x3] %v1988_v57 }

</bundles_post_ra>
